<compile_context>
chip_gen: v7x
topology: tpu7x:2x2x1
jax: 0.10.0
libtpu: 0.0.40
codegen_flags: <defaults>
</compile_context>

<pallas_src>
import functools

import jax
import jax.numpy as jnp
from jax.experimental import pallas as pl
from jax.experimental.pallas import tpu as pltpu

BETA = 1.0       # VQVAE.encode calls quantize(x, beta=1.0)
_LANE = 128


def _round_up(x, m):
    return (x + m - 1) // m * m


# ---------------------------------------------------------------------------
# Fused kernel: (enc+quant_conv) -> VQ -> (post_quant+dec) for one token tile
# ---------------------------------------------------------------------------
def fused_vqvae_kernel(x_ref, w1_ref, b1_ref, et_ref, esq_ref, w2_ref, b2_ref,
                       dec_ref, loss_ref, *, n_valid, tile_n, needs_mask):
    # --- encoder + quant_conv (folded 1x1 convs): bf16 MXU, f32 accumulate ---
    h = jnp.dot(x_ref[...], w1_ref[...],
                preferred_element_type=jnp.float32) + b1_ref[...]          # (T, D) f32

    T = h.shape[0]
    K = et_ref.shape[1]

    # --- vector quantizer: d = ||h||^2 + ||e||^2 - 2 <h, e> ---
    z_sq = jnp.sum(h * h, axis=1, keepdims=True)                           # (T, 1) f32
    cross = jnp.dot(h.astype(jnp.bfloat16), et_ref[...],
                    preferred_element_type=jnp.float32)                    # (T, K) MXU bf16
    d = z_sq + esq_ref[...] - 2.0 * cross                                  # (T, K) f32

    # First-occurrence argmin (matches torch.argmin tie-break), fully 2-D.
    # (jnp.argmin lowers to a variadic reduce Mosaic does not handle; keep manual.)
    iota_k = jax.lax.broadcasted_iota(jnp.int32, (T, K), 1)
    min_d = jnp.min(d, axis=1, keepdims=True)                              # (T, 1)
    idx = jnp.min(jnp.where(d == min_d, iota_k, K), axis=1, keepdims=True)  # (T, 1)

    # Codebook gather as a one-hot matmul; only e^T is resident, so contract K.
    one_hot = (iota_k == idx).astype(jnp.bfloat16)                         # (T, K)
    z_q = jax.lax.dot_general(one_hot, et_ref[...],
                              dimension_numbers=(((1,), (1,)), ((), ())),
                              preferred_element_type=jnp.float32)          # (T, D) f32
    # TODO(synk): for very large codebooks (tile_n*K slabs near the VMEM budget),
    # chunk K with a fori_loop carrying (min_d, idx) instead of shrinking tile_n.

    # Per-tile partial loss sum; padded rows masked out; the global mean
    # (divide by the *unpadded* N*D) happens in the wrapper so the grid axis
    # stays purely "parallel".
    per_row = jnp.sum((z_q - h) ** 2, axis=1, keepdims=True)               # (T, 1)
    if needs_mask:
        row = jax.lax.broadcasted_iota(jnp.int32, (T, 1), 0) + pl.program_id(0) * tile_n
        per_row = per_row * (row < n_valid).astype(jnp.float32)
    part = jnp.sum(per_row, axis=0, keepdims=True)                         # (1, 1)
    loss_ref[...] = jnp.broadcast_to(part, loss_ref.shape)                 # (8, 128) splat

    # Straight-through forward value == z_q; folded post_quant + decoder 1x1s.
    out = jnp.dot(z_q.astype(jnp.bfloat16), w2_ref[...],
                  preferred_element_type=jnp.float32) + b2_ref[...]        # (T, Cout_pad)
    dec_ref[...] = out.astype(dec_ref.dtype)                               # lane-dense store


def fused_forward_tokens(tokens, w1, b1, e_t, e_sq, w2, b2, *, tile_n, n_valid):
    n_pad, c_in = tokens.shape
    d_lat = w1.shape[1]
    k_codes = e_t.shape[1]
    c_out_pad = w2.shape[1]
    num_tiles = n_pad // tile_n

    kernel = functools.partial(
        fused_vqvae_kernel, n_valid=n_valid, tile_n=tile_n,
        needs_mask=(n_pad != n_valid))

    # Grid-invariant operands: single-buffered (their index_map is constant,
    # double buffering would only double the resident VMEM footprint).
    resident = dict(pipeline_mode=pl.Buffered(1))

    # Advisory cost for the XLA scheduler around the custom call.
    flops = 2 * n_pad * (c_in * d_lat + 2 * d_lat * k_codes + d_lat * c_out_pad)
    bytes_accessed = (
        n_pad * c_in * 2                                   # streamed tokens (bf16)
        + n_pad * c_out_pad * 2                            # decoded tokens (bf16)
        + num_tiles * 8 * _LANE * 4                        # loss slabs
        + (c_in * d_lat + d_lat * k_codes + d_lat * c_out_pad) * 2
        + (d_lat + k_codes + c_out_pad) * 4)

    # VMEM budget derived from the actual buffers, capped below v7x's 64 MiB.
    vmem_bytes = (
        2 * tile_n * c_in * 2                              # input tile (x2 buffers, bf16)
        + 2 * tile_n * c_out_pad * 2                       # decoded tile (x2, bf16)
        + 2 * 8 * _LANE * 4                                # loss slab (x2)
        + (c_in * d_lat + d_lat * k_codes + d_lat * c_out_pad) * 2  # bf16 constants (x1)
        + (d_lat + k_codes + c_out_pad) * 4                # f32 constants (x1)
        + 5 * tile_n * k_codes * 4                         # d/cross/one_hot/iota slabs
        + (2 << 20))                                       # headroom
    vmem_limit = int(min(max(vmem_bytes, 16 << 20), 56 << 20))

    return pl.pallas_call(
        kernel,
        out_shape=(
            jax.ShapeDtypeStruct((n_pad, c_out_pad), jnp.bfloat16),
            jax.ShapeDtypeStruct((num_tiles, 8, _LANE), jnp.float32),
        ),
        grid=(num_tiles,),
        in_specs=[
            pl.BlockSpec((tile_n, c_in), lambda i: (i, 0)),               # streamed tokens
            pl.BlockSpec((c_in, d_lat), lambda i: (0, 0), **resident),    # folded enc+quant W
            pl.BlockSpec((1, d_lat), lambda i: (0, 0), **resident),       # folded enc+quant b
            pl.BlockSpec((d_lat, k_codes), lambda i: (0, 0), **resident),  # codebook^T (bf16)
            pl.BlockSpec((1, k_codes), lambda i: (0, 0), **resident),     # ||e_k||^2 (f32)
            pl.BlockSpec((d_lat, c_out_pad), lambda i: (0, 0), **resident),  # folded post+dec W
            pl.BlockSpec((1, c_out_pad), lambda i: (0, 0), **resident),   # folded post+dec b
        ],
        out_specs=(
            pl.BlockSpec((tile_n, c_out_pad), lambda i: (i, 0)),          # lane-dense decode
            pl.BlockSpec((None, 8, _LANE), lambda i: (i, 0, 0)),          # per-tile loss slab
        ),
        compiler_params=pltpu.CompilerParams(
            dimension_semantics=("parallel",),
            vmem_limit_bytes=vmem_limit,
        ),
        cost_estimate=pl.CostEstimate(
            flops=flops, transcendentals=0, bytes_accessed=bytes_accessed),
    )(tokens, w1, b1, e_t, e_sq, w2, b2)


# ---------------------------------------------------------------------------
# Parameter init (deterministic, mirrors module __init__ shapes)
# ---------------------------------------------------------------------------
def init_params(key, *, in_channels, z_channels, embed_dim, n_embed, out_channels):
    ks = jax.random.split(key, 9)

    def lin(kw, kb, cin, cout):
        # PyTorch Conv2d weight is (Cout, Cin, 1, 1); stored transposed (Cin, Cout)
        # so the kernel consumes it directly as a matmul RHS.
        bound = 1.0 / jnp.sqrt(cin)
        w = jax.random.uniform(kw, (cin, cout), jnp.float32, -bound, bound)
        b = jax.random.uniform(kb, (1, cout), jnp.float32, -bound, bound)
        return w, b

    enc_w, enc_b = lin(ks[0], ks[1], in_channels, z_channels)
    quant_w, quant_b = lin(ks[2], ks[3], z_channels, embed_dim)
    post_w, post_b = lin(ks[4], ks[5], embed_dim, z_channels)
    dec_w, dec_b = lin(ks[6], ks[7], z_channels, out_channels)
    embed = jax.random.uniform(
        ks[8], (n_embed, embed_dim), jnp.float32, -1.0 / n_embed, 1.0 / n_embed)
    return dict(
        enc_w=enc_w, enc_b=enc_b,
        quant_w=quant_w, quant_b=quant_b,
        embed=embed,
        post_quant_w=post_w, post_quant_b=post_b,
        dec_w=dec_w, dec_b=dec_b,
    )


# ---------------------------------------------------------------------------
# VQVAE forward (glue in plain JAX, hot path in one fused Pallas kernel)
# ---------------------------------------------------------------------------
@functools.partial(jax.jit, static_argnames=("tile_n",))
def vqvae_forward(x, params, tile_n=512):
    B, Cin, H, W = x.shape
    N = B * H * W

    # Tile pick: pad N up to a multiple of the tile instead of shrinking it;
    # halve once only to keep >=2 tiles so v7x's two TCs both get work.
    tile = max(8, min(tile_n, _round_up(N, 8)))
    if pl.cdiv(N, tile) < 2 and tile > 8:
        tile = max(8, _round_up(tile // 2, 8))
    N_pad = _round_up(N, tile)

    # NCHW -> tokens, matching VectorQuantizer's `b c h w -> (b h w) c`.
    tokens = jnp.transpose(x, (0, 2, 3, 1)).reshape(N, Cin)
    if N_pad != N:
        tokens = jnp.pad(tokens, ((0, N_pad - N), (0, 0)))
    tokens = tokens.astype(jnp.bfloat16)   # stream tokens in bf16 (halves HBM traffic)

    # Fold adjacent 1x1 convs in f32, then cast matmul operands to bf16.
    w1 = params["enc_w"] @ params["quant_w"]                               # (Cin, D)
    b1 = params["enc_b"] @ params["quant_w"] + params["quant_b"]           # (1, D)
    w2 = params["post_quant_w"] @ params["dec_w"]                          # (D, Cout)
    b2 = params["post_quant_b"] @ params["dec_w"] + params["dec_b"]        # (1, Cout)

    Cout = w2.shape[1]
    Cout_pad = _round_up(Cout, _LANE)     # lane-dense decoder output
    w2 = jnp.pad(w2, ((0, 0), (0, Cout_pad - Cout)))
    b2 = jnp.pad(b2, ((0, 0), (0, Cout_pad - Cout)))

    e = params["embed"]                                                    # (K, D) f32
    e_t = e.T.astype(jnp.bfloat16)                                         # (D, K) only copy resident
    e_sq = jnp.sum(e * e, axis=1, keepdims=True).T                         # (1, K) f32, hoisted

    dec_tokens, loss_parts = fused_forward_tokens(
        tokens, w1.astype(jnp.bfloat16), b1, e_t, e_sq,
        w2.astype(jnp.bfloat16), b2, tile_n=tile, n_valid=N)

    # loss = beta*mean((sg[z_q]-z)^2) + mean((z_q-sg[z])^2); forward values coincide,
    # so loss = (1+beta) * sum((z_q-z)^2) / (unpadded N * D).
    D = e.shape[1]
    total = jnp.sum(loss_parts[:, 0, 0])
    loss = (1.0 + BETA) * total / jnp.float32(N * D)

    dec = dec_tokens[:N, :Cout].astype(x.dtype)
    dec = dec.reshape(B, H, W, Cout).transpose(0, 3, 1, 2)                 # tokens -> NCHW
    return dec, loss


if __name__ == "__main__":
    # Small, deterministic example shapes.
    B, C_in, H, W = 2, 4, 16, 16
    z_channels, embed_dim, n_embed, C_out = 8, 32, 128, 4

    key = jax.random.PRNGKey(0)
    k_x, k_p = jax.random.split(key)
    x = jax.random.normal(k_x, (B, C_in, H, W), jnp.float32)
    params = init_params(
        k_p,
        in_channels=C_in,
        z_channels=z_channels,
        embed_dim=embed_dim,
        n_embed=n_embed,
        out_channels=C_out,
    )

    dec, diff = vqvae_forward(x, params)
    dec, diff = jax.block_until_ready((dec, diff))

    assert dec.shape == (B, C_out, H, W)
    assert diff.shape == ()
    assert bool(jnp.all(jnp.isfinite(dec))) and bool(jnp.isfinite(diff))
    print("KERNEL_OK")
</pallas_src>

<mosaic_0001>
module attributes {stable_mosaic.version = 11 : i64} {
  func.func @fused_vqvae_kernel(%arg0: i32, %arg1: memref<256x4xbf16, #tpu.memory_space<vmem>>, %arg2: memref<4x32xbf16, #tpu.memory_space<vmem>>, %arg3: memref<1x32xf32, #tpu.memory_space<vmem>>, %arg4: memref<32x128xbf16, #tpu.memory_space<vmem>>, %arg5: memref<1x128xf32, #tpu.memory_space<vmem>>, %arg6: memref<32x128xbf16, #tpu.memory_space<vmem>>, %arg7: memref<1x128xf32, #tpu.memory_space<vmem>>, %arg8: memref<256x128xbf16, #tpu.memory_space<vmem>>, %arg9: memref<1x8x128xf32, #tpu.memory_space<vmem>>) attributes {dimension_semantics = [#tpu.dimension_semantics<parallel>], iteration_bounds = array<i64: 2>, scalar_prefetch = 0 : i64, scratch_operands = 0 : i64, tpu.core_type = #tpu.core_type<tc>, window_params = [{transform_indices = @transform_0, window_bounds = array<i64: 256, 4>}, {pipeline_mode = #tpu.pipeline_mode<synchronous>, transform_indices = @transform_1, window_bounds = array<i64: 4, 32>}, {pipeline_mode = #tpu.pipeline_mode<synchronous>, transform_indices = @transform_2, window_bounds = array<i64: 1, 32>}, {pipeline_mode = #tpu.pipeline_mode<synchronous>, transform_indices = @transform_3, window_bounds = array<i64: 32, 128>}, {pipeline_mode = #tpu.pipeline_mode<synchronous>, transform_indices = @transform_4, window_bounds = array<i64: 1, 128>}, {pipeline_mode = #tpu.pipeline_mode<synchronous>, transform_indices = @transform_5, window_bounds = array<i64: 32, 128>}, {pipeline_mode = #tpu.pipeline_mode<synchronous>, transform_indices = @transform_6, window_bounds = array<i64: 1, 128>}, {transform_indices = @transform_7, window_bounds = array<i64: 256, 128>}, {transform_indices = @transform_8, window_bounds = array<i64: 1, 8, 128>}]} {
    %c0 = arith.constant 0 : index
    %c0_0 = arith.constant 0 : index
    %0 = vector.load %arg1[%c0, %c0_0] : memref<256x4xbf16, #tpu.memory_space<vmem>>, vector<256x4xbf16>
    %c0_1 = arith.constant 0 : index
    %c0_2 = arith.constant 0 : index
    %1 = vector.load %arg2[%c0_1, %c0_2] : memref<4x32xbf16, #tpu.memory_space<vmem>>, vector<4x32xbf16>
    %cst = arith.constant dense<0.000000e+00> : vector<256x32xf32>
    %2 = tpu.matmul %0, %1, %cst {dimension_numbers = #tpu.dot_dimension_numbers<[1], [0], [0], [1], [0, 0, 1, 1], [], []>} : vector<256x4xbf16>, vector<4x32xbf16>, vector<256x32xf32> -> vector<256x32xf32>
    %c0_3 = arith.constant 0 : index
    %c0_4 = arith.constant 0 : index
    %3 = vector.load %arg3[%c0_3, %c0_4] : memref<1x32xf32, #tpu.memory_space<vmem>>, vector<1x32xf32>
    %4 = vector.broadcast %3 : vector<1x32xf32> to vector<256x32xf32>
    %5 = arith.addf %2, %4 : vector<256x32xf32>
    %6 = arith.mulf %5, %5 : vector<256x32xf32>
    %cst_5 = arith.constant dense<0.000000e+00> : vector<256xf32>
    %7 = vector.multi_reduction <add>, %6, %cst_5 [1] : vector<256x32xf32> to vector<256xf32>
    %8 = vector.shape_cast %7 : vector<256xf32> to vector<256x1xf32>
    %9 = arith.truncf %5 : vector<256x32xf32> to vector<256x32xbf16>
    %c0_6 = arith.constant 0 : index
    %c0_7 = arith.constant 0 : index
    %10 = vector.load %arg4[%c0_6, %c0_7] : memref<32x128xbf16, #tpu.memory_space<vmem>>, vector<32x128xbf16>
    %cst_8 = arith.constant dense<0.000000e+00> : vector<256x128xf32>
    %11 = tpu.matmul %9, %10, %cst_8 {dimension_numbers = #tpu.dot_dimension_numbers<[1], [0], [0], [1], [0, 0, 1, 1], [], []>} : vector<256x32xbf16>, vector<32x128xbf16>, vector<256x128xf32> -> vector<256x128xf32>
    %c0_9 = arith.constant 0 : index
    %c0_10 = arith.constant 0 : index
    %12 = vector.load %arg5[%c0_9, %c0_10] : memref<1x128xf32, #tpu.memory_space<vmem>>, vector<1x128xf32>
    %13 = vector.broadcast %8 : vector<256x1xf32> to vector<256x128xf32>
    %14 = vector.broadcast %12 : vector<1x128xf32> to vector<256x128xf32>
    %15 = arith.addf %13, %14 : vector<256x128xf32>
    %cst_11 = arith.constant 2.000000e+00 : f32
    %16 = vector.broadcast %cst_11 : f32 to vector<256x128xf32>
    %17 = arith.mulf %16, %11 : vector<256x128xf32>
    %18 = arith.subf %15, %17 : vector<256x128xf32>
    %19 = tpu.iota {dimensions = array<i32: 1>} : vector<256x128xi32>
    %cst_12 = arith.constant dense<0x7F800000> : vector<256xf32>
    %20 = vector.multi_reduction <minimumf>, %18, %cst_12 [1] : vector<256x128xf32> to vector<256xf32>
    %21 = vector.shape_cast %20 : vector<256xf32> to vector<256x1xf32>
    %22 = vector.broadcast %21 : vector<256x1xf32> to vector<256x128xf32>
    %23 = arith.cmpf oeq, %18, %22 : vector<256x128xf32>
    %c128_i32 = arith.constant 128 : i32
    %24 = vector.broadcast %c128_i32 : i32 to vector<256x128xi32>
    %25 = arith.select %23, %19, %24 : vector<256x128xi1>, vector<256x128xi32>
    %cst_13 = arith.constant dense<2147483647> : vector<256xi32>
    %26 = vector.multi_reduction <minsi>, %25, %cst_13 [1] : vector<256x128xi32> to vector<256xi32>
    %27 = vector.shape_cast %26 : vector<256xi32> to vector<256x1xi32>
    %28 = vector.broadcast %27 : vector<256x1xi32> to vector<256x128xi32>
    %29 = arith.cmpi eq, %19, %28 : vector<256x128xi32>
    %30 = arith.extui %29 : vector<256x128xi1> to vector<256x128xi32>
    %31 = arith.sitofp %30 : vector<256x128xi32> to vector<256x128xf32>
    %32 = arith.truncf %31 : vector<256x128xf32> to vector<256x128xbf16>
    %c0_14 = arith.constant 0 : index
    %c0_15 = arith.constant 0 : index
    %33 = vector.load %arg4[%c0_14, %c0_15] : memref<32x128xbf16, #tpu.memory_space<vmem>>, vector<32x128xbf16>
    %cst_16 = arith.constant dense<0.000000e+00> : vector<256x32xf32>
    %34 = tpu.matmul %32, %33, %cst_16 {dimension_numbers = #tpu.dot_dimension_numbers<[1], [1], [0], [0], [0, 0, 1, 0], [], []>} : vector<256x128xbf16>, vector<32x128xbf16>, vector<256x32xf32> -> vector<256x32xf32>
    %35 = arith.subf %34, %5 : vector<256x32xf32>
    %36 = arith.mulf %35, %35 : vector<256x32xf32>
    %cst_17 = arith.constant dense<0.000000e+00> : vector<256xf32>
    %37 = vector.multi_reduction <add>, %36, %cst_17 [1] : vector<256x32xf32> to vector<256xf32>
    %38 = vector.shape_cast %37 : vector<256xf32> to vector<256x1xf32>
    %cst_18 = arith.constant dense<0.000000e+00> : vector<1xf32>
    %39 = vector.multi_reduction <add>, %38, %cst_18 [0] : vector<256x1xf32> to vector<1xf32>
    %40 = vector.shape_cast %39 : vector<1xf32> to vector<1x1xf32>
    %41 = vector.shape_cast %40 : vector<1x1xf32> to vector<1x1xf32>
    %42 = vector.broadcast %41 : vector<1x1xf32> to vector<8x128xf32>
    %c0_19 = arith.constant 0 : index
    %c0_20 = arith.constant 0 : index
    %c0_21 = arith.constant 0 : index
    %43 = vector.load %arg9[%c0_19, %c0_20, %c0_21] : memref<1x8x128xf32, #tpu.memory_space<vmem>>, vector<1x8x128xf32>
    %44 = vector.shape_cast %43 : vector<1x8x128xf32> to vector<8x128xf32>
    %45 = vector.shape_cast %42 : vector<8x128xf32> to vector<1x8x128xf32>
    tpu.vector_store %arg9[%c0_19, %c0_20, %c0_21], %45 {strides = array<i32>} : memref<1x8x128xf32, #tpu.memory_space<vmem>>, vector<1x8x128xf32>,
    %46 = arith.truncf %34 : vector<256x32xf32> to vector<256x32xbf16>
    %c0_22 = arith.constant 0 : index
    %c0_23 = arith.constant 0 : index
    %47 = vector.load %arg6[%c0_22, %c0_23] : memref<32x128xbf16, #tpu.memory_space<vmem>>, vector<32x128xbf16>
    %cst_24 = arith.constant dense<0.000000e+00> : vector<256x128xf32>
    %48 = tpu.matmul %46, %47, %cst_24 {dimension_numbers = #tpu.dot_dimension_numbers<[1], [0], [0], [1], [0, 0, 1, 1], [], []>} : vector<256x32xbf16>, vector<32x128xbf16>, vector<256x128xf32> -> vector<256x128xf32>
    %c0_25 = arith.constant 0 : index
    %c0_26 = arith.constant 0 : index
    %49 = vector.load %arg7[%c0_25, %c0_26] : memref<1x128xf32, #tpu.memory_space<vmem>>, vector<1x128xf32>
    %50 = vector.broadcast %49 : vector<1x128xf32> to vector<256x128xf32>
    %51 = arith.addf %48, %50 : vector<256x128xf32>
    %52 = arith.truncf %51 : vector<256x128xf32> to vector<256x128xbf16>
    %c0_27 = arith.constant 0 : index
    %c0_28 = arith.constant 0 : index
    %53 = vector.load %arg8[%c0_27, %c0_28] : memref<256x128xbf16, #tpu.memory_space<vmem>>, vector<256x128xbf16>
    tpu.vector_store %arg8[%c0_27, %c0_28], %52 {strides = array<i32>} : memref<256x128xbf16, #tpu.memory_space<vmem>>, vector<256x128xbf16>,
    return
  }
  func.func @transform_0(%arg0: i32) -> (i32, i32) {
    %c0_i32 = arith.constant 0 : i32
    %c0_i32_0 = arith.constant 0 : i32
    return %arg0, %c0_i32 : i32, i32
  }
  func.func @transform_1(%arg0: i32) -> (i32, i32) {
    %c0_i32 = arith.constant 0 : i32
    %c0_i32_0 = arith.constant 0 : i32
    %c0_i32_1 = arith.constant 0 : i32
    return %c0_i32, %c0_i32_0 : i32, i32
  }
  func.func @transform_2(%arg0: i32) -> (i32, i32) {
    %c0_i32 = arith.constant 0 : i32
    %c0_i32_0 = arith.constant 0 : i32
    %c0_i32_1 = arith.constant 0 : i32
    return %c0_i32, %c0_i32_0 : i32, i32
  }
  func.func @transform_3(%arg0: i32) -> (i32, i32) {
    %c0_i32 = arith.constant 0 : i32
    %c0_i32_0 = arith.constant 0 : i32
    %c0_i32_1 = arith.constant 0 : i32
    return %c0_i32, %c0_i32_0 : i32, i32
  }
  func.func @transform_4(%arg0: i32) -> (i32, i32) {
    %c0_i32 = arith.constant 0 : i32
    %c0_i32_0 = arith.constant 0 : i32
    %c0_i32_1 = arith.constant 0 : i32
    return %c0_i32, %c0_i32_0 : i32, i32
  }
  func.func @transform_5(%arg0: i32) -> (i32, i32) {
    %c0_i32 = arith.constant 0 : i32
    %c0_i32_0 = arith.constant 0 : i32
    %c0_i32_1 = arith.constant 0 : i32
    return %c0_i32, %c0_i32_0 : i32, i32
  }
  func.func @transform_6(%arg0: i32) -> (i32, i32) {
    %c0_i32 = arith.constant 0 : i32
    %c0_i32_0 = arith.constant 0 : i32
    %c0_i32_1 = arith.constant 0 : i32
    return %c0_i32, %c0_i32_0 : i32, i32
  }
  func.func @transform_7(%arg0: i32) -> (i32, i32) {
    %c0_i32 = arith.constant 0 : i32
    %c0_i32_0 = arith.constant 0 : i32
    return %arg0, %c0_i32 : i32, i32
  }
  func.func @transform_8(%arg0: i32) -> (i32, i32, i32) {
    %c0_i32 = arith.constant 0 : i32
    %c0_i32_0 = arith.constant 0 : i32
    %c0_i32_1 = arith.constant 0 : i32
    return %arg0, %c0_i32, %c0_i32_0 : i32, i32, i32
  }
}

</mosaic_0001>

<bundles_post_ra>
// kernel: vqvae_forward.1
= control target key start
LH: loop header
LB: loop body
LE: loop exit
PB: predicated region body
PF: predicated region fallthrough
CT: control target
= control target key end

     0   :  { %s3275_s27 = smov 0   ;;  %s4367_s0 = inlined_call_operand.vmem [shape: bf16[512,4], index: 0, kind: input, shape index: {}]   ;;  %s4368_s1 = inlined_call_operand.vmem [shape: bf16[4,32], index: 1, kind: input, shape index: {}]   ;;  %s4369_s2 = inlined_call_operand.vmem [shape: f32[1,32], index: 2, kind: input, shape index: {}]   ;;  %s4370_s3 = inlined_call_operand.vmem [shape: bf16[32,128], index: 3, kind: input, shape index: {}]   ;;  %s4371_s4 = inlined_call_operand.vmem [shape: f32[1,128], index: 4, kind: input, shape index: {}]   ;;  %s4372_s5 = inlined_call_operand.vmem [shape: bf16[32,128], index: 5, kind: input, shape index: {}]   ;;  %s4373_s6 = inlined_call_operand.vmem [shape: f32[1,128], index: 6, kind: input, shape index: {}]   ;;  %s4374_s7 = inlined_call_operand.vmem [shape: bf16[512,128], index: 7, kind: output, shape index: {0}]   ;;  %s4375_s8 = inlined_call_operand.vmem [shape: f32[2,8,128], index: 8, kind: output, shape index: {1}]  }
   0x1 LB: > { %s3281_s28 = sadd.s32 4294967295, %s3227_s27   ;;  %p2676_p0 = scmp.ge.s32.totalorder %s3227_s27, 1  ;;  %s3227_s27 = sphi %s3275_s27, %s19_s27  }
   0x2   : > { %p266_p1 = scmp.lt.s32.totalorder %s3227_s27, 3 }
   0x4   : > { %p267_p2 = pnand %p2676_p0, %p266_p1 }
   0x6   : > { %270 = sbr.rel (%p267_p2) target bundleno = 1398 (0x576), region = 48 }
   0xd   : > { %v353_v0 = vld [vmem:[%s4368_s1] sm:$0x3]  ;;  %vm490_vm0 = vcmask 1041408   ;;  %s2677_s9 = sshll.u32 %s3281_s28, 5  ;;  %vm441_vm1 = vcmask 31744   ;;  %v3218_v19 = vld [vmem:[%s4370_s3 + $0x8] sm:$0xff]  }
   0xe   : > { %3191 = vmatprep.subr.msk.bf16.mxu0 %vm490_vm0, %v353_v0  ;;  %v492_v1 = vsel %vm490_vm0, %v353_v0, 0  ;;  %p305_p3 = scmp.lt.s32.totalorder %s2677_s9, 63  ;;  %v3217_v18 = vld [vmem:[%s4370_s3] sm:$0xff]   ;;  %vm687_vm2 = vcmask 261120   ;;  %p316_p4 = scmp.lt.s32.totalorder %s3281_s28, 1 }
   0xf   : > { %3050 = vmatpush3.bf16.msra.mxu0 %v492_v1  ;;  %3083 = vmatprep.subr.bf16.mxu1 %v3217_v18  ;;  %v3340_v20 = vld [vmem:[%s4369_s2] ss:$0 sm:$0xff] }
  0x10   : > { %s4507_s9 = smov (!%p305_p3, %s2677_s9), 63  ;;  %3119 = vmatprep.subr.bf16.mxu0 %v3217_v18  ;;  %3084 = vmatpush3.bf16.msra.mxu1 %v3217_v18  ;;  %s4509_s28 = smov (!%p316_p4, %s3281_s28), 1 }
  0x11   : > { %s2678_s10 = sshll.u32 %s4507_s9, 2  ;;  %3085 = vmatprep.subr.bf16.mxu1 %v3218_v19  ;;  %s2681_s30 = sshll.u32 %s4509_s28, 3 }
  0x12   : > { %s3297_s13 = scalar_lea.vmem %s4367_s0, %s2678_s10  ;;  %s4317_s28 = scalar_lea.vmem %s4374_s7, %s2678_s10 }
  0x13   : > { %v3201_v2 = vld [vmem:[%s3297_s13] sm:$0xff]   ;;  %v3202_v3 = vld [vmem:[%s3297_s13 + $0x8] sm:$0xff]   ;;  %v3203_v4 = vld [vmem:[%s3297_s13 + $0x10] sm:$0xff]  }
  0x14   : > { %3051 = vmatprep.mubr.msk.bf16.mxu0 %vm441_vm1, %v3201_v2  ;;  %v3204_v5 = vld [vmem:[%s3297_s13 + $0x18] sm:$0xff]   ;;  %v3205_v6 = vld [vmem:[%s3297_s13 + $0x20] sm:$0xff]   ;;  %v3206_v7 = vld [vmem:[%s3297_s13 + $0x28] sm:$0xff]   ;;  %3086 = vmatpush3.bf16.msra.mxu1 %v3218_v19 }
  0x15   : > { %3052 = vmatmul.mubr.msk.bf16.vlgmr.msra.gmra.mrb[0].mxu0 %vm441_vm1, %v3202_v3  ;;  %v3207_v8 = vld [vmem:[%s3297_s13 + $0x30] sm:$0xff]   ;;  %v3208_v9 = vld [vmem:[%s3297_s13 + $0x38] sm:$0xff]   ;;  %v3209_v10 = vld [vmem:[%s3297_s13 + $0x40] sm:$0xff]  }
  0x16   : > { %3055 = vmatprep.mubr.msk.bf16.mxu0 %vm441_vm1, %v3203_v4  ;;  %v3210_v11 = vld [vmem:[%s3297_s13 + $0x48] sm:$0xff]   ;;  %v3211_v12 = vld [vmem:[%s3297_s13 + $0x50] sm:$0xff]   ;;  %v3212_v13 = vld [vmem:[%s3297_s13 + $0x58] sm:$0xff]  }
  0x17   : > { %v3213_v14 = vld [vmem:[%s3297_s13 + $0x60] sm:$0xff]   ;;  %v3214_v15 = vld [vmem:[%s3297_s13 + $0x68] sm:$0xff]   ;;  %v3215_v16 = vld [vmem:[%s3297_s13 + $0x70] sm:$0xff]  }
  0x18   : > { %v3216_v17 = vld [vmem:[%s3297_s13 + $0x78] sm:$0xff]   ;;  %3120 = vmatpush3.bf16.xpose.msra.mxu0 %v3217_v18  ;;  %s319_s13 = scalar_lea.vmem %s4375_s8, %s2681_s30 }
  0x19   : > { %3121 = vmatprep.subr.bf16.mxu0 %v3218_v19 }
  0x1d   : > { %3056 = vmatmul.mubr.msk.bf16.gmra.mrb[4].mxu0 %vm441_vm1, %v3204_v5 }
  0x1e   : > { %3059 = vmatprep.mubr.msk.bf16.mxu0 %vm441_vm1, %v3205_v6 }
  0x20   : > { %3122 = vmatpush3.bf16.xpose.msra.mxu0 %v3218_v19 }
  0x25   : > { %3060 = vmatmul.mubr.msk.bf16.gmra.mrb[8].mxu0 %vm441_vm1, %v3206_v7 }
  0x26   : > { %3063 = vmatprep.mubr.msk.bf16.mxu0 %vm441_vm1, %v3207_v8 }
  0x2d   : > { %3064 = vmatmul.mubr.msk.bf16.gmra.mrb[12].mxu0 %vm441_vm1, %v3208_v9 }
  0x2e   : > { %3067 = vmatprep.mubr.msk.bf16.mxu0 %vm441_vm1, %v3209_v10 }
  0x35   : > { %3068 = vmatmul.mubr.msk.bf16.gmra.mrb[16].mxu0 %vm441_vm1, %v3210_v11 }
  0x36   : > { %3071 = vmatprep.mubr.msk.bf16.mxu0 %vm441_vm1, %v3211_v12 }
  0x3d   : > { %3072 = vmatmul.mubr.msk.bf16.gmra.mrb[20].mxu0 %vm441_vm1, %v3212_v13 }
  0x3e   : > { %3075 = vmatprep.mubr.msk.bf16.mxu0 %vm441_vm1, %v3213_v14 }
  0x45   : > { %3076 = vmatmul.mubr.msk.bf16.gmra.mrb[24].mxu0 %vm441_vm1, %v3214_v15 }
  0x46   : > { %3079 = vmatprep.mubr.msk.bf16.mxu0 %vm441_vm1, %v3215_v16 }
  0x4d   : > { %3080 = vmatmul.mubr.msk.bf16.gmra.mrb[28].mxu0 %vm441_vm1, %v3216_v17 }
  0xe8   : > { %v3053_v21 = vpop.f32.mrb[0].mxu0 }
  0xe9   : > { %v3343_v22 = vadd.f32 %v3053_v21, %v3340_v20  ;;  %v528_v23 = vpop.f32.mrb[1].mxu0 }
  0xea   : > { %v3346_v24 = vadd.f32 %v3340_v20, %v528_v23  ;;  %v3054_v25 = vpop.f32.mrb[2].mxu0 }
  0xeb   : > { %4420 = vst [vmem:[#allocation2_spill] sm:$0xff] %v3343_v22  ;;  %v3349_v26 = vadd.f32 %v3054_v25, %v3340_v20  ;;  %v531_v27 = vpop.f32.mrb[3].mxu0  ;;  %v657_v28 = vmul.f32 %v3343_v22, %v3343_v22 }
  0xec   : > { %4421 = vst [vmem:[#allocation3_spill] sm:$0xff] %v3346_v24  ;;  %v3354_v29 = vadd.f32 %v3340_v20, %v531_v27  ;;  %v655_v30 = vmul.f32 %v3346_v24, %v3346_v24 }
  0xed   : > { %4422 = vst [vmem:[#allocation4_spill] sm:$0xff] %v3349_v26  ;;  %v694_v31 = vsel %vm687_vm2, %v657_v28, 0.0  ;;  %v658_v32 = vmul.f32 %v3349_v26, %v3349_v26  ;;  %v785_v36 = vpack.c.bf16 %v3349_v26, %v3343_v22 }
  0xee   : > { %4423 = vst [vmem:[#allocation5_spill] sm:$0xff] %v3354_v29  ;;  %695 = vadd.xlane.f32.xlu1 %v694_v31  ;;  %v688_v33 = vsel %vm687_vm2, %v655_v30, 0.0  ;;  %v784_v34 = vpack.c.bf16 %v3354_v29, %v3346_v24  ;;  %v656_v35 = vmul.f32 %v3354_v29, %v3354_v29 }
  0xef   : > { %689 = vadd.xlane.f32.xlu0 %v688_v33  ;;  %v697_v39 = vsel %vm687_vm2, %v658_v32, 0.0 }
  0xf0   : > { %v3057_v37 = vpop.f32.mrb[4].mxu0  ;;  %3087 = vmatprep.mubr.msk.bf16.mxu1 %vm687_vm2, %v784_v34  ;;  %v691_v43 = vsel %vm687_vm2, %v656_v35, 0.0 }
  0xf1   : > { %v544_v38 = vpop.f32.mrb[5].mxu0  ;;  %3088 = vmatmul.mubr.msk.bf16.vlgmr.msra.gmra.mrb[0].mxu1 %vm687_vm2, %v785_v36  ;;  %v3372_v40 = vadd.f32 %v3057_v37, %v3340_v20 }
  0xf2   : > { %v3375_v41 = vadd.f32 %v3340_v20, %v544_v38  ;;  %698 = vadd.xlane.f32.xlu1 %v697_v39  ;;  %v3058_v42 = vpop.f32.mrb[6].mxu0 }
  0xf3   : > { %4424 = vst [vmem:[#allocation6_spill] sm:$0xff] %v3372_v40  ;;  %v3379_v44 = vadd.f32 %v3058_v42, %v3340_v20  ;;  %v547_v45 = vpop.f32.mrb[7].mxu0  ;;  %692 = vadd.xlane.f32.xlu0 %v691_v43  ;;  %v661_v51 = vmul.f32 %v3372_v40, %v3372_v40 }
  0xf4   : > { %4425 = vst [vmem:[#allocation7_spill] sm:$0xff] %v3375_v41  ;;  %v3382_v46 = vadd.f32 %v3340_v20, %v547_v45  ;;  %v659_v47 = vmul.f32 %v3375_v41, %v3375_v41 }
  0xf5   : > { %4426 = vst [vmem:[#allocation8_spill] sm:$0xff] %v3379_v44  ;;  %v787_v52 = vpack.c.bf16 %v3379_v44, %v3372_v40  ;;  %v662_v55 = vmul.f32 %v3379_v44, %v3379_v44  ;;  %v706_v60 = vsel %vm687_vm2, %v661_v51, 0.0 }
  0xf6   : > { %4427 = vst [vmem:[#allocation9_spill] sm:$0xff] %v3382_v46  ;;  %v786_v48 = vpack.c.bf16 %v3382_v46, %v3375_v41  ;;  %v700_v49 = vsel %vm687_vm2, %v659_v47, 0.0  ;;  %v660_v50 = vmul.f32 %v3382_v46, %v3382_v46 }
  0xf7   : > { %701 = vadd.xlane.f32.xlu0 %v700_v49  ;;  %v709_v0 = vsel %vm687_vm2, %v662_v55, 0.0 }
  0xf8   : > { %v3061_v53 = vpop.f32.mrb[8].mxu0  ;;  %3091 = vmatprep.mubr.msk.bf16.mxu1 %vm687_vm2, %v786_v48  ;;  %v703_v54 = vsel %vm687_vm2, %v660_v50, 0.0 }
  0xf9   : > { %v560_v56 = vpop.f32.mrb[9].mxu0  ;;  %704 = vadd.xlane.f32.xlu1 %v703_v54  ;;  %3092 = vmatmul.mubr.msk.bf16.gmra.mrb[4].mxu1 %vm687_vm2, %v787_v52  ;;  %v3401_v57 = vadd.f32 %v3061_v53, %v3340_v20 }
  0xfa   : > { %v3404_v58 = vadd.f32 %v3340_v20, %v560_v56  ;;  %v3062_v59 = vpop.f32.mrb[10].mxu0 }
  0xfb   : > { %4428 = vst [vmem:[#allocation10_spill] sm:$0xff] %v3401_v57  ;;  %v3408_v61 = vadd.f32 %v3062_v59, %v3340_v20  ;;  %v563_v62 = vpop.f32.mrb[11].mxu0  ;;  %707 = vadd.xlane.f32.xlu0 %v706_v60  ;;  %v665_v5 = vmul.f32 %v3401_v57, %v3401_v57 }
  0xfc   : > { %4429 = vst [vmem:[#allocation11_spill] sm:$0xff] %v3404_v58  ;;  %v3411_v63 = vadd.f32 %v3340_v20, %v563_v62  ;;  %v663_v1 = vmul.f32 %v3404_v58, %v3404_v58 }
  0xfd   : > { %4430 = vst [vmem:[#allocation12_spill] sm:$0xff] %v3408_v61  ;;  %710 = vadd.xlane.f32.xlu1 %v709_v0  ;;  %v789_v6 = vpack.c.bf16 %v3408_v61, %v3401_v57  ;;  %v666_v9 = vmul.f32 %v3408_v61, %v3408_v61  ;;  %v718_v14 = vsel %vm687_vm2, %v665_v5, 0.0 }
  0xfe   : > { %4431 = vst [vmem:[#allocation13_spill] sm:$0xff] %v3411_v63  ;;  %v788_v2 = vpack.c.bf16 %v3411_v63, %v3404_v58  ;;  %v712_v3 = vsel %vm687_vm2, %v663_v1, 0.0  ;;  %v664_v4 = vmul.f32 %v3411_v63, %v3411_v63 }
  0xff   : > { %713 = vadd.xlane.f32.xlu0 %v712_v3  ;;  %v721_v18 = vsel %vm687_vm2, %v666_v9, 0.0 }
 0x100   : > { %v3065_v7 = vpop.f32.mrb[12].mxu0  ;;  %3095 = vmatprep.mubr.msk.bf16.mxu1 %vm687_vm2, %v788_v2  ;;  %v715_v8 = vsel %vm687_vm2, %v664_v4, 0.0 }
 0x101   : > { %v576_v10 = vpop.f32.mrb[13].mxu0  ;;  %716 = vadd.xlane.f32.xlu1 %v715_v8  ;;  %3096 = vmatmul.mubr.msk.bf16.gmra.mrb[8].mxu1 %vm687_vm2, %v789_v6  ;;  %v3431_v11 = vadd.f32 %v3065_v7, %v3340_v20 }
 0x102   : > { %v3434_v12 = vadd.f32 %v3340_v20, %v576_v10  ;;  %v3066_v13 = vpop.f32.mrb[14].mxu0 }
 0x103   : > { %4432 = vst [vmem:[#allocation14_spill] sm:$0xff] %v3431_v11  ;;  %v3438_v15 = vadd.f32 %v3066_v13, %v3340_v20  ;;  %v579_v16 = vpop.f32.mrb[15].mxu0  ;;  %719 = vadd.xlane.f32.xlu0 %v718_v14  ;;  %v669_v27 = vmul.f32 %v3431_v11, %v3431_v11 }
 0x104   : > { %4433 = vst [vmem:[#allocation15_spill] sm:$0xff] %v3434_v12  ;;  %v3441_v17 = vadd.f32 %v3340_v20, %v579_v16  ;;  %v667_v19 = vmul.f32 %v3434_v12, %v3434_v12 }
 0x105   : > { %4434 = vst [vmem:[#allocation16_spill] sm:$0xff] %v3438_v15  ;;  %722 = vadd.xlane.f32.xlu1 %v721_v18  ;;  %v791_v28 = vpack.c.bf16 %v3438_v15, %v3431_v11  ;;  %v670_v32 = vmul.f32 %v3438_v15, %v3438_v15  ;;  %v730_v37 = vsel %vm687_vm2, %v669_v27, 0.0 }
 0x106   : > { %4435 = vst [vmem:[#allocation17_spill] sm:$0xff] %v3441_v17  ;;  %v790_v21 = vpack.c.bf16 %v3441_v17, %v3434_v12  ;;  %v724_v23 = vsel %vm687_vm2, %v667_v19, 0.0  ;;  %v668_v25 = vmul.f32 %v3441_v17, %v3441_v17 }
 0x107   : > { %725 = vadd.xlane.f32.xlu0 %v724_v23  ;;  %v733_v43 = vsel %vm687_vm2, %v670_v32, 0.0 }
 0x108   : > { %v3069_v30 = vpop.f32.mrb[16].mxu0  ;;  %3099 = vmatprep.mubr.msk.bf16.mxu1 %vm687_vm2, %v790_v21  ;;  %v727_v31 = vsel %vm687_vm2, %v668_v25, 0.0 }
 0x109   : > { %v592_v33 = vpop.f32.mrb[17].mxu0  ;;  %728 = vadd.xlane.f32.xlu1 %v727_v31  ;;  %3100 = vmatmul.mubr.msk.bf16.gmra.mrb[12].mxu1 %vm687_vm2, %v791_v28  ;;  %v3461_v34 = vadd.f32 %v3069_v30, %v3340_v20 }
 0x10a   : > { %v3464_v35 = vadd.f32 %v3340_v20, %v592_v33  ;;  %v3070_v36 = vpop.f32.mrb[18].mxu0 }
 0x10b   : > { %4436 = vst [vmem:[#allocation18_spill] sm:$0xff] %v3461_v34  ;;  %v3468_v38 = vadd.f32 %v3070_v36, %v3340_v20  ;;  %v595_v39 = vpop.f32.mrb[19].mxu0  ;;  %731 = vadd.xlane.f32.xlu0 %v730_v37  ;;  %v673_v50 = vmul.f32 %v3461_v34, %v3461_v34 }
 0x10c   : > { %4437 = vst [vmem:[#allocation19_spill] sm:$0xff] %v3464_v35  ;;  %v3471_v42 = vadd.f32 %v3340_v20, %v595_v39  ;;  %v671_v45 = vmul.f32 %v3464_v35, %v3464_v35 }
 0x10d   : > { %4438 = vst [vmem:[#allocation20_spill] sm:$0xff] %v3468_v38  ;;  %734 = vadd.xlane.f32.xlu1 %v733_v43  ;;  %v793_v51 = vpack.c.bf16 %v3468_v38, %v3461_v34  ;;  %v674_v54 = vmul.f32 %v3468_v38, %v3468_v38  ;;  %v742_v62 = vsel %vm687_vm2, %v673_v50, 0.0 }
 0x10e   : > { %4439 = vst [vmem:[#allocation21_spill] sm:$0xff] %v3471_v42  ;;  %v792_v47 = vpack.c.bf16 %v3471_v42, %v3464_v35  ;;  %v736_v48 = vsel %vm687_vm2, %v671_v45, 0.0  ;;  %v672_v49 = vmul.f32 %v3471_v42, %v3471_v42 }
 0x10f   : > { %737 = vadd.xlane.f32.xlu0 %v736_v48  ;;  %v745_v3 = vsel %vm687_vm2, %v674_v54, 0.0 }
 0x110   : > { %v3073_v52 = vpop.f32.mrb[20].mxu0  ;;  %3103 = vmatprep.mubr.msk.bf16.mxu1 %vm687_vm2, %v792_v47  ;;  %v739_v53 = vsel %vm687_vm2, %v672_v49, 0.0 }
 0x111   : > { %v608_v55 = vpop.f32.mrb[21].mxu0  ;;  %740 = vadd.xlane.f32.xlu1 %v739_v53  ;;  %3104 = vmatmul.mubr.msk.bf16.gmra.mrb[16].mxu1 %vm687_vm2, %v793_v51  ;;  %v3491_v56 = vadd.f32 %v3073_v52, %v3340_v20 }
 0x112   : > { %v3494_v59 = vadd.f32 %v3340_v20, %v608_v55  ;;  %v3074_v60 = vpop.f32.mrb[22].mxu0 }
 0x113   : > { %4440 = vst [vmem:[#allocation22_spill] sm:$0xff] %v3491_v56  ;;  %v3498_v0 = vadd.f32 %v3074_v60, %v3340_v20  ;;  %v611_v1 = vpop.f32.mrb[23].mxu0  ;;  %743 = vadd.xlane.f32.xlu0 %v742_v62  ;;  %v677_v8 = vmul.f32 %v3491_v56, %v3491_v56 }
 0x114   : > { %4441 = vst [vmem:[#allocation23_spill] sm:$0xff] %v3494_v59  ;;  %v3501_v2 = vadd.f32 %v3340_v20, %v611_v1  ;;  %v675_v4 = vmul.f32 %v3494_v59, %v3494_v59 }
 0x115   : > { %4442 = vst [vmem:[#allocation24_spill] sm:$0xff] %v3498_v0  ;;  %746 = vadd.xlane.f32.xlu1 %v745_v3  ;;  %v795_v9 = vpack.c.bf16 %v3498_v0, %v3491_v56  ;;  %v678_v14 = vmul.f32 %v3498_v0, %v3498_v0  ;;  %v754_v23 = vsel %vm687_vm2, %v677_v8, 0.0 }
 0x116   : > { %4443 = vst [vmem:[#allocation25_spill] sm:$0xff] %v3501_v2  ;;  %v794_v5 = vpack.c.bf16 %v3501_v2, %v3494_v59  ;;  %v748_v6 = vsel %vm687_vm2, %v675_v4, 0.0  ;;  %v676_v7 = vmul.f32 %v3501_v2, %v3501_v2 }
 0x117   : > { %749 = vadd.xlane.f32.xlu0 %v748_v6  ;;  %v757_v30 = vsel %vm687_vm2, %v678_v14, 0.0 }
 0x118   : > { %v3077_v10 = vpop.f32.mrb[24].mxu0  ;;  %3107 = vmatprep.mubr.msk.bf16.mxu1 %vm687_vm2, %v794_v5  ;;  %v751_v13 = vsel %vm687_vm2, %v676_v7, 0.0 }
 0x119   : > { %v624_v16 = vpop.f32.mrb[25].mxu0  ;;  %752 = vadd.xlane.f32.xlu1 %v751_v13  ;;  %3108 = vmatmul.mubr.msk.bf16.gmra.mrb[20].mxu1 %vm687_vm2, %v795_v9  ;;  %v3521_v18 = vadd.f32 %v3077_v10, %v3340_v20 }
 0x11a   : > { %v3524_v19 = vadd.f32 %v3340_v20, %v624_v16  ;;  %v3078_v21 = vpop.f32.mrb[26].mxu0 }
 0x11b   : > { %4444 = vst [vmem:[#allocation26_spill] sm:$0xff] %v3521_v18  ;;  %v3528_v25 = vadd.f32 %v3078_v21, %v3340_v20  ;;  %v627_v27 = vpop.f32.mrb[27].mxu0  ;;  %755 = vadd.xlane.f32.xlu0 %v754_v23  ;;  %v681_v37 = vmul.f32 %v3521_v18, %v3521_v18 }
 0x11c   : > { %4445 = vst [vmem:[#allocation27_spill] sm:$0xff] %v3524_v19  ;;  %v3531_v28 = vadd.f32 %v3340_v20, %v627_v27  ;;  %v679_v31 = vmul.f32 %v3524_v19, %v3524_v19 }
 0x11d   : > { %4446 = vst [vmem:[#allocation28_spill] sm:$0xff] %v3528_v25  ;;  %758 = vadd.xlane.f32.xlu1 %v757_v30  ;;  %v797_v39 = vpack.c.bf16 %v3528_v25, %v3521_v18  ;;  %v682_v47 = vmul.f32 %v3528_v25, %v3528_v25  ;;  %v766_v52 = vsel %vm687_vm2, %v681_v37, 0.0 }
 0x11e   : > { %4447 = vst [vmem:[#allocation29_spill] sm:$0xff] %v3531_v28  ;;  %v796_v32 = vpack.c.bf16 %v3531_v28, %v3524_v19  ;;  %v760_v33 = vsel %vm687_vm2, %v679_v31, 0.0  ;;  %v680_v36 = vmul.f32 %v3531_v28, %v3531_v28 }
 0x11f   : > { %761 = vadd.xlane.f32.xlu0 %v760_v33  ;;  %v769_v60 = vsel %vm687_vm2, %v682_v47, 0.0  ;;  %v3585_v33 = vld [vmem:[%s4371_s4] ss:$0 sm:$0xff] }
 0x120   : > { %v3081_v43 = vpop.f32.mrb[28].mxu0  ;;  %3111 = vmatprep.mubr.msk.bf16.mxu1 %vm687_vm2, %v796_v32  ;;  %v763_v45 = vsel %vm687_vm2, %v680_v36, 0.0 }
 0x121   : > { %v640_v48 = vpop.f32.mrb[29].mxu0  ;;  %764 = vadd.xlane.f32.xlu1 %v763_v45  ;;  %3112 = vmatmul.mubr.msk.bf16.gmra.mrb[24].mxu1 %vm687_vm2, %v797_v39  ;;  %v3551_v49 = vadd.f32 %v3081_v43, %v3340_v20 }
 0x122   : > { %v3554_v50 = vadd.f32 %v3340_v20, %v640_v48  ;;  %v3082_v51 = vpop.f32.mrb[30].mxu0 }
 0x123   : > { %4448 = vst [vmem:[#allocation30_spill] sm:$0xff] %v3551_v49  ;;  %v3558_v53 = vadd.f32 %v3082_v51, %v3340_v20  ;;  %v643_v54 = vpop.f32.mrb[31].mxu0  ;;  %767 = vadd.xlane.f32.xlu0 %v766_v52  ;;  %v685_v5 = vmul.f32 %v3551_v49, %v3551_v49 }
 0x124   : > { %4449 = vst [vmem:[#allocation31_spill] sm:$0xff] %v3554_v50  ;;  %v3561_v55 = vadd.f32 %v3340_v20, %v643_v54  ;;  %v683_v62 = vmul.f32 %v3554_v50, %v3554_v50 }
 0x125   : > { %4450 = vst [vmem:[#allocation32_spill] sm:$0xff] %v3558_v53  ;;  %770 = vadd.xlane.f32.xlu1 %v769_v60  ;;  %v799_v20 = vpack.c.bf16 %v3558_v53, %v3551_v49  ;;  %v686_v7 = vmul.f32 %v3558_v53, %v3558_v53  ;;  %v778_v8 = vsel %vm687_vm2, %v685_v5, 0.0 }
 0x126   : > { %4451 = vst [vmem:[#allocation33_spill] sm:$0xff] %v3561_v55  ;;  %v798_v1 = vpack.c.bf16 %v3561_v55, %v3554_v50  ;;  %v772_v3 = vsel %vm687_vm2, %v683_v62, 0.0  ;;  %v684_v4 = vmul.f32 %v3561_v55, %v3561_v55 }
 0x127   : > { %773 = vadd.xlane.f32.xlu0 %v772_v3  ;;  %v781_v9 = vsel %vm687_vm2, %v686_v7, 0.0 }
 0x128   : > { %3115 = vmatprep.mubr.msk.bf16.mxu1 %vm687_vm2, %v798_v1  ;;  %v775_v6 = vsel %vm687_vm2, %v684_v4, 0.0 }
 0x129   : > { %776 = vadd.xlane.f32.xlu1 %v775_v6  ;;  %3116 = vmatmul.mubr.msk.bf16.gmra.mrb[28].mxu1 %vm687_vm2, %v799_v20 }
 0x12b   : > { %779 = vadd.xlane.f32.xlu0 %v778_v8 }
 0x12d   : > { %782 = vadd.xlane.f32.xlu1 %v781_v9 }
 0x17b   : > { %v696_v13 = vpop.xlane.xlu1 %695 }
 0x17c   : > { %v690_v10 = vpop.xlane.xlu0 %689  ;;  %v1034_v3 = vadd.f32 %v3585_v33, %v696_v13 }
 0x17d   : > { %v1032_v45 = vadd.f32 %v3585_v33, %v690_v10 }
 0x17f   : > { %v699_v16 = vpop.xlane.xlu1 %698 }
 0x180   : > { %v693_v14 = vpop.xlane.xlu0 %692  ;;  %v1035_v6 = vadd.f32 %v3585_v33, %v699_v16 }
 0x181   : > { %v1033_v52 = vadd.f32 %v3585_v33, %v693_v14 }
 0x184   : > { %v702_v21 = vpop.xlane.xlu0 %701 }
 0x185   : > { %v1036_v10 = vadd.f32 %v3585_v33, %v702_v21 }
 0x186   : > { %v705_v23 = vpop.xlane.xlu1 %704 }
 0x188   : > { %v708_v27 = vpop.xlane.xlu0 %707 }
 0x18a   : > { %v711_v30 = vpop.xlane.xlu1 %710 }
 0x18c   : > { %v714_v31 = vpop.xlane.xlu0 %713 }
 0x18e   : > { %v717_v32 = vpop.xlane.xlu1 %716 }
 0x190   : > { %v720_v36 = vpop.xlane.xlu0 %719 }
 0x192   : > { %v723_v39 = vpop.xlane.xlu1 %722 }
 0x194   : > { %v726_v1 = vpop.xlane.xlu0 %725 }
 0x196   : > { %v729_v20 = vpop.xlane.xlu1 %728 }
 0x1c4   : > { %v3089_v37 = vpop.f32.mrb[0].mxu1 }
 0x1c5   : > { %v898_v43 = vpop.f32.mrb[1].mxu1  ;;  %v1066_v54 = vmul.f32 2.0, %v3089_v37 }
 0x1c6   : > { %v1064_v47 = vmul.f32 2.0, %v898_v43  ;;  %v3090_v48 = vpop.f32.mrb[2].mxu1  ;;  %v732_v43 = vpop.xlane.xlu0 %731 }
 0x1c7   : > { %v901_v51 = vpop.f32.mrb[3].mxu1  ;;  %v1067_v4 = vmul.f32 2.0, %v3090_v48  ;;  %v3597_v8 = vsub.f32 %v1034_v3, %v1066_v54  ;;  %v1038_v54 = vadd.f32 %v3585_v33, %v708_v27  ;;  %v1039_v3 = vadd.f32 %v3585_v33, %v711_v30 }
 0x1c8   : > { %v1065_v60 = vmul.f32 2.0, %v901_v51  ;;  %v3589_v62 = vsub.f32 %v1032_v45, %v1064_v47  ;;  %v1037_v47 = vadd.f32 %v3585_v33, %v705_v23 }
 0x1c9   : > { %v3601_v13 = vsub.f32 %v1035_v6, %v1067_v4 }
 0x1ca   : > { %1130 = vmin.xlane.f32.xlu0 %v3589_v62  ;;  %v3593_v5 = vsub.f32 %v1033_v52, %v1065_v60  ;;  %v735_v52 = vpop.xlane.xlu1 %734  ;;  %v738_v6 = vpop.xlane.xlu0 %737 }
 0x1cc   : > { %v3093_v7 = vpop.f32.mrb[4].mxu1  ;;  %1132 = vmin.xlane.f32.xlu1 %v3593_v5 }
 0x1cd   : > { %v914_v9 = vpop.f32.mrb[5].mxu1  ;;  %v1070_v48 = vmul.f32 2.0, %v3093_v7 }
 0x1ce   : > { %v1068_v14 = vmul.f32 2.0, %v914_v9  ;;  %v3094_v37 = vpop.f32.mrb[6].mxu1  ;;  %1134 = vmin.xlane.f32.xlu0 %v3597_v8  ;;  %v1040_v9 = vadd.f32 %v3585_v33, %v714_v31 }
 0x1cf   : > { %v917_v45 = vpop.f32.mrb[7].mxu1  ;;  %v1071_v21 = vmul.f32 2.0, %v3094_v37  ;;  %v3613_v23 = vsub.f32 %v1038_v54, %v1070_v48  ;;  %v741_v37 = vpop.xlane.xlu1 %740  ;;  %v1042_v54 = vadd.f32 %v3585_v33, %v720_v36 }
 0x1d0   : > { %v1069_v16 = vmul.f32 2.0, %v917_v45  ;;  %1136 = vmin.xlane.f32.xlu1 %v3601_v13  ;;  %v3605_v51 = vsub.f32 %v1036_v10, %v1068_v14 }
 0x1d1   : > { %v3617_v27 = vsub.f32 %v1039_v3, %v1071_v21  ;;  %v1043_v21 = vadd.f32 %v3585_v33, %v723_v39 }
 0x1d2   : > { %1138 = vmin.xlane.f32.xlu0 %v3605_v51  ;;  %v3609_v60 = vsub.f32 %v1037_v47, %v1069_v16  ;;  %v1041_v47 = vadd.f32 %v3585_v33, %v717_v32 }
 0x1d4   : > { %v3097_v4 = vpop.f32.mrb[8].mxu1  ;;  %1140 = vmin.xlane.f32.xlu1 %v3609_v60 }
 0x1d5   : > { %v930_v7 = vpop.f32.mrb[9].mxu1  ;;  %v1074_v30 = vmul.f32 2.0, %v3097_v4  ;;  %v747_v4 = vpop.xlane.xlu1 %746 }
 0x1d6   : > { %v1072_v10 = vmul.f32 2.0, %v930_v7  ;;  %v3098_v14 = vpop.f32.mrb[10].mxu1  ;;  %1142 = vmin.xlane.f32.xlu0 %v3613_v23  ;;  %v744_v7 = vpop.xlane.xlu0 %743 }
 0x1d7   : > { %v933_v45 = vpop.f32.mrb[11].mxu1  ;;  %v1075_v55 = vmul.f32 2.0, %v3098_v14  ;;  %v3629_v32 = vsub.f32 %v1042_v54, %v1074_v30  ;;  %v1046_v54 = vadd.f32 %v3585_v33, %v732_v43 }
 0x1d8   : > { %v1073_v16 = vmul.f32 2.0, %v933_v45  ;;  %1144 = vmin.xlane.f32.xlu1 %v3617_v27  ;;  %v3621_v48 = vsub.f32 %v1040_v9, %v1072_v10  ;;  %v1044_v9 = vadd.f32 %v3585_v33, %v726_v1 }
 0x1d9   : > { %v3633_v36 = vsub.f32 %v1043_v21, %v1075_v55  ;;  %v1047_v55 = vadd.f32 %v3585_v33, %v735_v52 }
 0x1da   : > { %1146 = vmin.xlane.f32.xlu0 %v3621_v48  ;;  %v3625_v31 = vsub.f32 %v1041_v47, %v1073_v16  ;;  %v1045_v47 = vadd.f32 %v3585_v33, %v729_v20  ;;  %v750_v30 = vpop.xlane.xlu0 %749 }
 0x1dc   : > { %v3101_v3 = vpop.f32.mrb[12].mxu1  ;;  %1148 = vmin.xlane.f32.xlu1 %v3625_v31 }
 0x1dd   : > { %v946_v45 = vpop.f32.mrb[13].mxu1  ;;  %v1078_v16 = vmul.f32 2.0, %v3101_v3 }
 0x1de   : > { %v1076_v10 = vmul.f32 2.0, %v946_v45  ;;  %v3102_v53 = vpop.f32.mrb[14].mxu1  ;;  %1150 = vmin.xlane.f32.xlu0 %v3629_v32  ;;  %v753_v45 = vpop.xlane.xlu1 %752 }
 0x1df   : > { %v949_v14 = vpop.f32.mrb[15].mxu1  ;;  %v1079_v49 = vmul.f32 2.0, %v3102_v53  ;;  %v3645_v20 = vsub.f32 %v1046_v54, %v1078_v16  ;;  %v756_v43 = vpop.xlane.xlu0 %755  ;;  %v1050_v54 = vadd.f32 %v3585_v33, %v744_v7 }
 0x1e0   : > { %v1077_v39 = vmul.f32 2.0, %v949_v14  ;;  %1152 = vmin.xlane.f32.xlu1 %v3633_v36  ;;  %v3637_v50 = vsub.f32 %v1044_v9, %v1076_v10  ;;  %v1048_v9 = vadd.f32 %v3585_v33, %v738_v6 }
 0x1e1   : > { %v3649_v53 = vsub.f32 %v1047_v55, %v1079_v49  ;;  %v1051_v49 = vadd.f32 %v3585_v33, %v747_v4 }
 0x1e2   : > { %1154 = vmin.xlane.f32.xlu0 %v3637_v50  ;;  %v3641_v1 = vsub.f32 %v1045_v47, %v1077_v39  ;;  %v1049_v39 = vadd.f32 %v3585_v33, %v741_v37  ;;  %v759_v16 = vpop.xlane.xlu1 %758 }
 0x1e4   : > { %v3105_v21 = vpop.f32.mrb[16].mxu1  ;;  %1156 = vmin.xlane.f32.xlu1 %v3641_v1 }
 0x1e5   : > { %v962_v3 = vpop.f32.mrb[17].mxu1  ;;  %v1082_v28 = vmul.f32 2.0, %v3105_v21  ;;  %v762_v21 = vpop.xlane.xlu0 %761 }
 0x1e6   : > { %v1080_v10 = vmul.f32 2.0, %v962_v3  ;;  %v3106_v14 = vpop.f32.mrb[18].mxu1  ;;  %1158 = vmin.xlane.f32.xlu0 %v3645_v20 }
 0x1e7   : > { %v965_v47 = vpop.f32.mrb[19].mxu1  ;;  %v1083_v6 = vmul.f32 2.0, %v3106_v14  ;;  %v3661_v37 = vsub.f32 %v1050_v54, %v1082_v28  ;;  %v765_v14 = vpop.xlane.xlu1 %764  ;;  %v1054_v54 = vadd.f32 %v3585_v33, %v756_v43 }
 0x1e8   : > { %v1081_v52 = vmul.f32 2.0, %v965_v47  ;;  %1160 = vmin.xlane.f32.xlu1 %v3649_v53  ;;  %v3653_v25 = vsub.f32 %v1048_v9, %v1080_v10  ;;  %v1052_v9 = vadd.f32 %v3585_v33, %v750_v30  ;;  %v1057_v43 = vadd.f32 %v3585_v33, %v765_v14 }
 0x1e9   : > { %v3665_v7 = vsub.f32 %v1051_v49, %v1083_v6  ;;  %v1055_v6 = vadd.f32 %v3585_v33, %v759_v16 }
 0x1ea   : > { %1162 = vmin.xlane.f32.xlu0 %v3653_v25  ;;  %v3657_v3 = vsub.f32 %v1049_v39, %v1081_v52  ;;  %v1053_v52 = vadd.f32 %v3585_v33, %v753_v45 }
 0x1ec   : > { %v3109_v55 = vpop.f32.mrb[20].mxu1  ;;  %1164 = vmin.xlane.f32.xlu1 %v3657_v3 }
 0x1ed   : > { %v978_v47 = vpop.f32.mrb[21].mxu1  ;;  %v1086_v4 = vmul.f32 2.0, %v3109_v55  ;;  %v771_v55 = vpop.xlane.xlu1 %770 }
 0x1ee   : > { %v1084_v10 = vmul.f32 2.0, %v978_v47  ;;  %v3110_v19 = vpop.f32.mrb[22].mxu1  ;;  %1166 = vmin.xlane.f32.xlu0 %v3661_v37  ;;  %v768_v47 = vpop.xlane.xlu0 %767 }
 0x1ef   : > { %v981_v39 = vpop.f32.mrb[23].mxu1  ;;  %v1087_v2 = vmul.f32 2.0, %v3110_v19  ;;  %v3677_v45 = vsub.f32 %v1054_v54, %v1086_v4  ;;  %v1058_v54 = vadd.f32 %v3585_v33, %v768_v47 }
 0x1f0   : > { %v1085_v18 = vmul.f32 2.0, %v981_v39  ;;  %1168 = vmin.xlane.f32.xlu1 %v3665_v7  ;;  %v3669_v28 = vsub.f32 %v1052_v9, %v1084_v10  ;;  %v1056_v9 = vadd.f32 %v3585_v33, %v762_v21 }
 0x1f1   : > { %v3681_v19 = vsub.f32 %v1055_v6, %v1087_v2  ;;  %v1059_v2 = vadd.f32 %v3585_v33, %v771_v55 }
 0x1f2   : > { %1170 = vmin.xlane.f32.xlu0 %v3669_v28  ;;  %v3673_v30 = vsub.f32 %v1053_v52, %v1085_v18  ;;  %v774_v4 = vpop.xlane.xlu0 %773 }
 0x1f4   : > { %v3113_v49 = vpop.f32.mrb[24].mxu1  ;;  %1172 = vmin.xlane.f32.xlu1 %v3673_v30 }
 0x1f5   : > { %v994_v39 = vpop.f32.mrb[25].mxu1  ;;  %v1090_v52 = vmul.f32 2.0, %v3113_v49 }
 0x1f6   : > { %v1088_v10 = vmul.f32 2.0, %v994_v39  ;;  %v3114_v0 = vpop.f32.mrb[26].mxu1  ;;  %1174 = vmin.xlane.f32.xlu0 %v3677_v45  ;;  %v777_v39 = vpop.xlane.xlu1 %776 }
 0x1f7   : > { %v997_v18 = vpop.f32.mrb[27].mxu1  ;;  %v1091_v56 = vmul.f32 2.0, %v3114_v0  ;;  %v3693_v14 = vsub.f32 %v1058_v54, %v1090_v52  ;;  %v780_v47 = vpop.xlane.xlu0 %779 }
 0x1f8   : > { %v1089_v16 = vmul.f32 2.0, %v997_v18  ;;  %1176 = vmin.xlane.f32.xlu1 %v3681_v19  ;;  %v3685_v59 = vsub.f32 %v1056_v9, %v1088_v10  ;;  %v1060_v9 = vadd.f32 %v3585_v33, %v774_v4  ;;  %v1062_v54 = vadd.f32 %v3585_v33, %v780_v47 }
 0x1f9   : > { %v3697_v0 = vsub.f32 %v1059_v2, %v1091_v56 }
 0x1fa   : > { %1178 = vmin.xlane.f32.xlu0 %v3685_v59  ;;  %v3689_v21 = vsub.f32 %v1057_v43, %v1089_v16  ;;  %v1061_v16 = vadd.f32 %v3585_v33, %v777_v39  ;;  %v783_v52 = vpop.xlane.xlu1 %782 }
 0x1fb   : > { %v1063_v56 = vadd.f32 %v3585_v33, %v783_v52 }
 0x1fc   : > { %v3117_v6 = vpop.f32.mrb[28].mxu1  ;;  %1180 = vmin.xlane.f32.xlu1 %v3689_v21 }
 0x1fd   : > { %v1010_v49 = vpop.f32.mrb[29].mxu1  ;;  %v1094_v42 = vmul.f32 2.0, %v3117_v6  ;;  %v1128_v6 = vlaneseq }
 0x1fe   : > { %v1092_v10 = vmul.f32 2.0, %v1010_v49  ;;  %v3118_v18 = vpop.f32.mrb[30].mxu1  ;;  %1182 = vmin.xlane.f32.xlu0 %v3693_v14 }
 0x1ff   : > { %v1013_v43 = vpop.f32.mrb[31].mxu1  ;;  %v1095_v4 = vmul.f32 2.0, %v3118_v18  ;;  %v3709_v2 = vsub.f32 %v1062_v54, %v1094_v42 }
 0x200   : > { %v1093_v55 = vmul.f32 2.0, %v1013_v43  ;;  %1184 = vmin.xlane.f32.xlu1 %v3697_v0  ;;  %v3701_v38 = vsub.f32 %v1060_v9, %v1092_v10  ;;  %v3715_v9 = vand.u32 127, %v1128_v6 }
 0x201   : > { %v3712_v39 = vsub.f32 %v1063_v56, %v1095_v4 }
 0x202   : > { %1186 = vmin.xlane.f32.xlu0 %v3701_v38  ;;  %v3705_v49 = vsub.f32 %v1061_v16, %v1093_v55  ;;  %4452 = vst [vmem:[#allocation34_spill] sm:$0xff] %v3715_v9 }
 0x204   : > { %1188 = vmin.xlane.f32.xlu1 %v3705_v49 }
 0x206   : > { %1190 = vmin.xlane.f32.xlu0 %v3709_v2 }
 0x208   : > { %1192 = vmin.xlane.f32.xlu1 %v3712_v39 }
 0x257   : > { %v1131_v10 = vpop.xlane.xlu0 %1130 }
 0x258   : > { %vm1194_vm3 = vcmp.eq.f32.partialorder %v3589_v62, %v1131_v10 }
 0x259   : > { %v3719_v18 = vsel %vm1194_vm3, %v3715_v9, 128  ;;  %v1133_v33 = vpop.xlane.xlu1 %1132 }
 0x25a   : > { %vm1195_vm4 = vcmp.eq.f32.partialorder %v3593_v5, %v1133_v33  ;;  %v1259_v42 = vshra.s32 %v3719_v18, 16 }
 0x25b   : > { %v3724_v47 = vsel %vm1195_vm4, %v3715_v9, 128  ;;  %v1135_v43 = vpop.xlane.xlu0 %1134 }
 0x25c   : > { %vm1196_vm5 = vcmp.eq.f32.partialorder %v3597_v8, %v1135_v43  ;;  %v3727_v16 = vcvt.s32.f32 %v1259_v42  ;;  %v1273_v55 = vshra.s32 %v3724_v47, 16 }
 0x25d   : > { %v3731_v62 = vsel %vm1196_vm5, %v3715_v9, 128  ;;  %v1137_v52 = vpop.xlane.xlu1 %1136 }
 0x25e   : > { %vm1197_vm6 = vcmp.eq.f32.partialorder %v3601_v13, %v1137_v52  ;;  %1262 = vmin.xlane.f32.xlu0 %v3727_v16  ;;  %v3735_v5 = vcvt.s32.f32 %v1273_v55  ;;  %v1287_v54 = vshra.s32 %v3731_v62, 16 }
 0x25f   : > { %v3739_v4 = vsel %vm1197_vm6, %v3715_v9, 128  ;;  %v1139_v8 = vpop.xlane.xlu0 %1138 }
 0x260   : > { %vm1198_vm7 = vcmp.eq.f32.partialorder %v3605_v51, %v1139_v8  ;;  %1276 = vmin.xlane.f32.xlu1 %v3735_v5  ;;  %v3743_v56 = vcvt.s32.f32 %v1287_v54  ;;  %v1301_v6 = vshra.s32 %v3739_v4, 16 }
 0x261   : > { %v3747_v13 = vsel %vm1198_vm7, %v3715_v9, 128  ;;  %v1141_v10 = vpop.xlane.xlu1 %1140 }
 0x262   : > { %vm1199_vm8 = vcmp.eq.f32.partialorder %v3609_v60, %v1141_v10  ;;  %1290 = vmin.xlane.f32.xlu0 %v3743_v56  ;;  %v3751_v33 = vcvt.s32.f32 %v1301_v6  ;;  %v1315_v42 = vshra.s32 %v3747_v13, 16 }
 0x263   : > { %v3755_v51 = vsel %vm1199_vm8, %v3715_v9, 128  ;;  %v1143_v43 = vpop.xlane.xlu0 %1142 }
 0x264   : > { %vm1200_vm9 = vcmp.eq.f32.partialorder %v3613_v23, %v1143_v43  ;;  %1304 = vmin.xlane.f32.xlu1 %v3751_v33  ;;  %v3759_v55 = vcvt.s32.f32 %v1315_v42  ;;  %v1329_v52 = vshra.s32 %v3755_v51, 16 }
 0x265   : > { %v3763_v60 = vsel %vm1200_vm9, %v3715_v9, 128  ;;  %v1145_v54 = vpop.xlane.xlu1 %1144 }
 0x266   : > { %vm1201_vm10 = vcmp.eq.f32.partialorder %v3617_v27, %v1145_v54  ;;  %1318 = vmin.xlane.f32.xlu0 %v3759_v55  ;;  %v3767_v8 = vcvt.s32.f32 %v1329_v52  ;;  %v1343_v6 = vshra.s32 %v3763_v60, 16 }
 0x267   : > { %v3771_v23 = vsel %vm1201_vm10, %v3715_v9, 128  ;;  %v1147_v10 = vpop.xlane.xlu0 %1146 }
 0x268   : > { %vm1202_vm11 = vcmp.eq.f32.partialorder %v3621_v48, %v1147_v10  ;;  %1332 = vmin.xlane.f32.xlu1 %v3767_v8  ;;  %v3775_v42 = vcvt.s32.f32 %v1343_v6  ;;  %v1357_v43 = vshra.s32 %v3771_v23, 16 }
 0x269   : > { %v3779_v27 = vsel %vm1202_vm11, %v3715_v9, 128  ;;  %v1149_v54 = vpop.xlane.xlu1 %1148 }
 0x26a   : > { %vm1203_vm12 = vcmp.eq.f32.partialorder %v3625_v31, %v1149_v54  ;;  %1346 = vmin.xlane.f32.xlu0 %v3775_v42  ;;  %v3783_v52 = vcvt.s32.f32 %v1357_v43  ;;  %v1371_v35 = vshra.s32 %v3779_v27, 16 }
 0x26b   : > { %v3787_v48 = vsel %vm1203_vm12, %v3715_v9, 128  ;;  %v1151_v10 = vpop.xlane.xlu0 %1150 }
 0x26c   : > { %vm1204_vm13 = vcmp.eq.f32.partialorder %v3629_v32, %v1151_v10  ;;  %1360 = vmin.xlane.f32.xlu1 %v3783_v52  ;;  %v3791_v6 = vcvt.s32.f32 %v1371_v35  ;;  %v1385_v34 = vshra.s32 %v3787_v48, 16 }
 0x26d   : > { %v3795_v31 = vsel %vm1204_vm13, %v3715_v9, 128  ;;  %v1153_v54 = vpop.xlane.xlu1 %1152 }
 0x26e   : > { %vm1205_vm14 = vcmp.eq.f32.partialorder %v3633_v36, %v1153_v54  ;;  %1374 = vmin.xlane.f32.xlu0 %v3791_v6  ;;  %v3799_v43 = vcvt.s32.f32 %v1385_v34  ;;  %v1399_v17 = vshra.s32 %v3795_v31, 16 }
 0x26f   : > { %v3803_v32 = vsel %vm1205_vm14, %v3715_v9, 128  ;;  %v1155_v10 = vpop.xlane.xlu0 %1154 }
 0x270   : > { %vm1206_vm15 = vcmp.eq.f32.partialorder %v3637_v50, %v1155_v10  ;;  %1388 = vmin.xlane.f32.xlu1 %v3799_v43  ;;  %v3807_v35 = vcvt.s32.f32 %v1399_v17  ;;  %v1413_v15 = vshra.s32 %v3803_v32, 16 }
 0x271   : > { %v3811_v36 = vsel %vm1206_vm15, %v3715_v9, 128  ;;  %v1157_v54 = vpop.xlane.xlu1 %1156 }
 0x272   : > { %vm1207_vm0 = vcmp.eq.f32.partialorder %v3641_v1, %v1157_v54  ;;  %1402 = vmin.xlane.f32.xlu0 %v3807_v35  ;;  %v3815_v34 = vcvt.s32.f32 %v1413_v15  ;;  %v1427_v12 = vshra.s32 %v3811_v36, 16 }
 0x273   : > { %v3819_v50 = vsel %vm1207_vm0, %v3715_v9, 128  ;;  %v1159_v10 = vpop.xlane.xlu0 %1158 }
 0x274   : > { %vm1208_vm1 = vcmp.eq.f32.partialorder %v3645_v20, %v1159_v10  ;;  %1416 = vmin.xlane.f32.xlu1 %v3815_v34  ;;  %v3823_v17 = vcvt.s32.f32 %v1427_v12  ;;  %v1441_v11 = vshra.s32 %v3819_v50, 16 }
 0x275   : > { %v3827_v1 = vsel %vm1208_vm1, %v3715_v9, 128  ;;  %v1161_v54 = vpop.xlane.xlu1 %1160 }
 0x276   : > { %vm1209_vm3 = vcmp.eq.f32.partialorder %v3649_v53, %v1161_v54  ;;  %1430 = vmin.xlane.f32.xlu0 %v3823_v17  ;;  %v3831_v15 = vcvt.s32.f32 %v1441_v11  ;;  %v1455_v63 = vshra.s32 %v3827_v1, 16 }
 0x277   : > { %v3835_v20 = vsel %vm1209_vm3, %v3715_v9, 128  ;;  %v1163_v10 = vpop.xlane.xlu0 %1162 }
 0x278   : > { %vm1210_vm4 = vcmp.eq.f32.partialorder %v3653_v25, %v1163_v10  ;;  %1444 = vmin.xlane.f32.xlu1 %v3831_v15  ;;  %v3839_v12 = vcvt.s32.f32 %v1455_v63  ;;  %v1469_v61 = vshra.s32 %v3835_v20, 16 }
 0x279   : > { %v3843_v53 = vsel %vm1210_vm4, %v3715_v9, 128  ;;  %v1165_v54 = vpop.xlane.xlu1 %1164 }
 0x27a   : > { %vm1211_vm5 = vcmp.eq.f32.partialorder %v3657_v3, %v1165_v54  ;;  %1458 = vmin.xlane.f32.xlu0 %v3839_v12  ;;  %v3847_v11 = vcvt.s32.f32 %v1469_v61  ;;  %v1483_v58 = vshra.s32 %v3843_v53, 16 }
 0x27b   : > { %v3851_v25 = vsel %vm1211_vm5, %v3715_v9, 128  ;;  %v1167_v10 = vpop.xlane.xlu0 %1166 }
 0x27c   : > { %vm1212_vm6 = vcmp.eq.f32.partialorder %v3661_v37, %v1167_v10  ;;  %1472 = vmin.xlane.f32.xlu1 %v3847_v11  ;;  %v3855_v63 = vcvt.s32.f32 %v1483_v58  ;;  %v1497_v57 = vshra.s32 %v3851_v25, 16 }
 0x27d   : > { %v3859_v3 = vsel %vm1212_vm6, %v3715_v9, 128  ;;  %v1169_v54 = vpop.xlane.xlu1 %1168 }
 0x27e   : > { %vm1213_vm7 = vcmp.eq.f32.partialorder %v3665_v7, %v1169_v54  ;;  %1486 = vmin.xlane.f32.xlu0 %v3855_v63  ;;  %v3863_v61 = vcvt.s32.f32 %v1497_v57  ;;  %v1511_v46 = vshra.s32 %v3859_v3, 16 }
 0x27f   : > { %v3867_v37 = vsel %vm1213_vm7, %v3715_v9, 128  ;;  %v1171_v10 = vpop.xlane.xlu0 %1170 }
 0x280   : > { %vm1214_vm8 = vcmp.eq.f32.partialorder %v3669_v28, %v1171_v10  ;;  %1500 = vmin.xlane.f32.xlu1 %v3863_v61  ;;  %v3871_v58 = vcvt.s32.f32 %v1511_v46  ;;  %v1525_v44 = vshra.s32 %v3867_v37, 16 }
 0x281   : > { %v3875_v7 = vsel %vm1214_vm8, %v3715_v9, 128  ;;  %v1173_v54 = vpop.xlane.xlu1 %1172 }
 0x282   : > { %vm1215_vm9 = vcmp.eq.f32.partialorder %v3673_v30, %v1173_v54  ;;  %1514 = vmin.xlane.f32.xlu0 %v3871_v58  ;;  %v3879_v57 = vcvt.s32.f32 %v1525_v44  ;;  %v1539_v41 = vshra.s32 %v3875_v7, 16 }
 0x283   : > { %v3883_v28 = vsel %vm1215_vm9, %v3715_v9, 128  ;;  %v1175_v10 = vpop.xlane.xlu0 %1174 }
 0x284   : > { %vm1216_vm10 = vcmp.eq.f32.partialorder %v3677_v45, %v1175_v10  ;;  %1528 = vmin.xlane.f32.xlu1 %v3879_v57  ;;  %v3887_v46 = vcvt.s32.f32 %v1539_v41  ;;  %v1553_v40 = vshra.s32 %v3883_v28, 16 }
 0x285   : > { %v3891_v30 = vsel %vm1216_vm10, %v3715_v9, 128  ;;  %v1177_v54 = vpop.xlane.xlu1 %1176 }
 0x286   : > { %vm1217_vm11 = vcmp.eq.f32.partialorder %v3681_v19, %v1177_v54  ;;  %1542 = vmin.xlane.f32.xlu0 %v3887_v46  ;;  %v3895_v44 = vcvt.s32.f32 %v1553_v40  ;;  %v1567_v29 = vshra.s32 %v3891_v30, 16 }
 0x287   : > { %v3899_v45 = vsel %vm1217_vm11, %v3715_v9, 128  ;;  %v1179_v10 = vpop.xlane.xlu0 %1178 }
 0x288   : > { %vm1218_vm12 = vcmp.eq.f32.partialorder %v3685_v59, %v1179_v10  ;;  %1556 = vmin.xlane.f32.xlu1 %v3895_v44  ;;  %v3903_v41 = vcvt.s32.f32 %v1567_v29  ;;  %v1581_v26 = vshra.s32 %v3899_v45, 16 }
 0x289   : > { %v3907_v19 = vsel %vm1218_vm12, %v3715_v9, 128  ;;  %v1181_v54 = vpop.xlane.xlu1 %1180 }
 0x28a   : > { %4453 = vst [vmem:[#allocation35_spill] sm:$0xff] %v3903_v41  ;;  %vm1219_vm13 = vcmp.eq.f32.partialorder %v3689_v21, %v1181_v54  ;;  %1570 = vmin.xlane.f32.xlu0 %v3903_v41  ;;  %v3911_v40 = vcvt.s32.f32 %v1581_v26  ;;  %v1595_v24 = vshra.s32 %v3907_v19, 16 }
 0x28b   : > { %v3915_v59 = vsel %vm1219_vm13, %v3715_v9, 128  ;;  %v1183_v10 = vpop.xlane.xlu0 %1182 }
 0x28c   : > { %4454 = vst [vmem:[#allocation36_spill] sm:$0xff] %v3911_v40  ;;  %vm1220_vm14 = vcmp.eq.f32.partialorder %v3693_v14, %v1183_v10  ;;  %1584 = vmin.xlane.f32.xlu1 %v3911_v40  ;;  %v3919_v29 = vcvt.s32.f32 %v1595_v24  ;;  %v1609_v22 = vshra.s32 %v3915_v59, 16 }
 0x28d   : > { %v3923_v21 = vsel %vm1220_vm14, %v3715_v9, 128  ;;  %v1185_v54 = vpop.xlane.xlu1 %1184 }
 0x28e   : > { %4455 = vst [vmem:[#allocation37_spill] sm:$0xff] %v3919_v29  ;;  %vm1221_vm15 = vcmp.eq.f32.partialorder %v3697_v0, %v1185_v54  ;;  %1598 = vmin.xlane.f32.xlu0 %v3919_v29  ;;  %v3927_v26 = vcvt.s32.f32 %v1609_v22  ;;  %v1623_v41 = vshra.s32 %v3923_v21, 16 }
 0x28f   : > { %v3931_v14 = vsel %vm1221_vm15, %v3715_v9, 128  ;;  %v1187_v10 = vpop.xlane.xlu0 %1186 }
 0x290   : > { %4456 = vst [vmem:[#allocation38_spill] sm:$0xff] %v3927_v26  ;;  %vm1222_vm0 = vcmp.eq.f32.partialorder %v3701_v38, %v1187_v10  ;;  %1612 = vmin.xlane.f32.xlu1 %v3927_v26  ;;  %v3935_v24 = vcvt.s32.f32 %v1623_v41  ;;  %v1637_v40 = vshra.s32 %v3931_v14, 16 }
 0x291   : > { %v3939_v0 = vsel %vm1222_vm0, %v3715_v9, 128  ;;  %v1189_v54 = vpop.xlane.xlu1 %1188 }
 0x292   : > { %4457 = vst [vmem:[#allocation39_spill] sm:$0xff] %v3935_v24  ;;  %vm1223_vm1 = vcmp.eq.f32.partialorder %v3705_v49, %v1189_v54  ;;  %1626 = vmin.xlane.f32.xlu0 %v3935_v24  ;;  %v3943_v22 = vcvt.s32.f32 %v1637_v40  ;;  %v1651_v29 = vshra.s32 %v3939_v0, 16 }
 0x293   : > { %v3947_v38 = vsel %vm1223_vm1, %v3715_v9, 128  ;;  %v1191_v10 = vpop.xlane.xlu0 %1190 }
 0x294   : > { %4458 = vst [vmem:[#allocation40_spill] sm:$0xff] %v3943_v22  ;;  %vm1224_vm3 = vcmp.eq.f32.partialorder %v3709_v2, %v1191_v10  ;;  %1640 = vmin.xlane.f32.xlu1 %v3943_v22  ;;  %v3951_v41 = vcvt.s32.f32 %v1651_v29  ;;  %v1665_v26 = vshra.s32 %v3947_v38, 16 }
 0x295   : > { %v3955_v49 = vsel %vm1224_vm3, %v3715_v9, 128  ;;  %v1193_v54 = vpop.xlane.xlu1 %1192 }
 0x296   : > { %4459 = vst [vmem:[#allocation41_spill] sm:$0xff] %v3951_v41  ;;  %vm1225_vm4 = vcmp.eq.f32.partialorder %v3712_v39, %v1193_v54  ;;  %1654 = vmin.xlane.f32.xlu0 %v3951_v41  ;;  %v3959_v40 = vcvt.s32.f32 %v1665_v26  ;;  %v1679_v24 = vshra.s32 %v3955_v49, 16  ;;  %v1258_v39 = vand.u32 65535, %v3719_v18 }
 0x297   : > { %v3963_v2 = vsel %vm1225_vm4, %v3715_v9, 128  ;;  %v1272_v26 = vand.u32 65535, %v3724_v47  ;;  %v1286_v54 = vand.u32 65535, %v3731_v62  ;;  %v1314_v18 = vand.u32 65535, %v3747_v13 }
 0x298   : > { %4460 = vst [vmem:[#allocation42_spill] sm:$0xff] %v3959_v40  ;;  %1668 = vmin.xlane.f32.xlu1 %v3959_v40  ;;  %v3966_v29 = vcvt.s32.f32 %v1679_v24  ;;  %v1693_v10 = vshra.s32 %v3963_v2, 16  ;;  %v1260_v41 = vcvt.s32.f32 %v1258_v39  ;;  %v1300_v24 = vand.u32 65535, %v3739_v4 }
 0x29a   : > { %4461 = vst [vmem:[#allocation43_spill] sm:$0xff] %v3966_v29  ;;  %1682 = vmin.xlane.f32.xlu0 %v3966_v29  ;;  %v3970_v22 = vcvt.s32.f32 %v1693_v10  ;;  %v1274_v29 = vcvt.s32.f32 %v1272_v26  ;;  %v1302_v39 = vcvt.s32.f32 %v1300_v24  ;;  %v1316_v26 = vcvt.s32.f32 %v1314_v18 }
 0x29c   : > { %4462 = vst [vmem:[#allocation44_spill] sm:$0xff] %v3970_v22  ;;  %1696 = vmin.xlane.f32.xlu1 %v3970_v22  ;;  %v1288_v22 = vcvt.s32.f32 %v1286_v54 }
 0x2eb   : > { %v3976_v9 = vpop.xlane.xlu0 %1262 }
 0x2ec   : > { %vm1264_vm5 = vcmp.eq.f32.partialorder %v3727_v16, %v3976_v9  ;;  %v1328_v16 = vand.u32 65535, %v3755_v51 }
 0x2ed   : > { %v3981_v40 = vpop.xlane.xlu1 %1276  ;;  %v1265_v10 = vsel %vm1264_vm5, %v1260_v41, inf }
 0x2ee   : > { %1266 = vmin.xlane.f32.xlu0 %v1265_v10  ;;  %vm1278_vm6 = vcmp.eq.f32.partialorder %v3735_v5, %v3981_v40  ;;  %v1342_v5 = vand.u32 65535, %v3763_v60  ;;  %v1330_v54 = vcvt.s32.f32 %v1328_v16 }
 0x2ef   : > { %v3986_v47 = vpop.xlane.xlu0 %1290  ;;  %v1279_v62 = vsel %vm1278_vm6, %v1274_v29, inf }
 0x2f0   : > { %vm1292_vm7 = vcmp.eq.f32.partialorder %v3743_v56, %v3986_v47  ;;  %1280 = vmin.xlane.f32.xlu1 %v1279_v62  ;;  %v1356_v56 = vand.u32 65535, %v3771_v23  ;;  %v1344_v10 = vcvt.s32.f32 %v1342_v5 }
 0x2f1   : > { %v3991_v4 = vpop.xlane.xlu1 %1304  ;;  %v1293_v41 = vsel %vm1292_vm7, %v1288_v22, inf }
 0x2f2   : > { %vm1306_vm8 = vcmp.eq.f32.partialorder %v3751_v33, %v3991_v4  ;;  %1294 = vmin.xlane.f32.xlu0 %v1293_v41  ;;  %v1370_v33 = vand.u32 65535, %v3779_v27  ;;  %v1358_v62 = vcvt.s32.f32 %v1356_v56 }
 0x2f3   : > { %v3996_v13 = vpop.xlane.xlu0 %1318  ;;  %v1307_v29 = vsel %vm1306_vm8, %v1302_v39, inf }
 0x2f4   : > { %vm1320_vm9 = vcmp.eq.f32.partialorder %v3759_v55, %v3996_v13  ;;  %1308 = vmin.xlane.f32.xlu1 %v1307_v29  ;;  %v1384_v55 = vand.u32 65535, %v3787_v48  ;;  %v1372_v41 = vcvt.s32.f32 %v1370_v33 }
 0x2f5   : > { %v4001_v51 = vpop.xlane.xlu1 %1332  ;;  %v1321_v22 = vsel %vm1320_vm9, %v1316_v26, inf }
 0x2f6   : > { %vm1334_vm10 = vcmp.eq.f32.partialorder %v3767_v8, %v4001_v51  ;;  %1322 = vmin.xlane.f32.xlu0 %v1321_v22  ;;  %v1398_v8 = vand.u32 65535, %v3795_v31  ;;  %v1386_v5 = vcvt.s32.f32 %v1384_v55 }
 0x2f7   : > { %v4006_v60 = vpop.xlane.xlu0 %1346  ;;  %v1335_v24 = vsel %vm1334_vm10, %v1330_v54, inf }
 0x2f8   : > { %vm1348_vm11 = vcmp.eq.f32.partialorder %v3775_v42, %v4006_v60  ;;  %1336 = vmin.xlane.f32.xlu1 %v1335_v24  ;;  %v1412_v42 = vand.u32 65535, %v3803_v32  ;;  %v1400_v26 = vcvt.s32.f32 %v1398_v8 }
 0x2f9   : > { %v4011_v23 = vpop.xlane.xlu1 %1360  ;;  %v1349_v18 = vsel %vm1348_vm11, %v1344_v10, inf }
 0x2fa   : > { %vm1362_vm12 = vcmp.eq.f32.partialorder %v3783_v52, %v4011_v23  ;;  %1350 = vmin.xlane.f32.xlu0 %v1349_v18  ;;  %v1426_v52 = vand.u32 65535, %v3811_v36  ;;  %v1414_v22 = vcvt.s32.f32 %v1412_v42 }
 0x2fb   : > { %v4016_v27 = vpop.xlane.xlu0 %1374  ;;  %v1363_v16 = vsel %vm1362_vm12, %v1358_v62, inf }
 0x2fc   : > { %vm1376_vm13 = vcmp.eq.f32.partialorder %v3791_v6, %v4016_v27  ;;  %1364 = vmin.xlane.f32.xlu1 %v1363_v16  ;;  %v1440_v6 = vand.u32 65535, %v3819_v50  ;;  %v1428_v33 = vcvt.s32.f32 %v1426_v52 }
 0x2fd   : > { %v4021_v48 = vpop.xlane.xlu1 %1388  ;;  %v1377_v39 = vsel %vm1376_vm13, %v1372_v41, inf }
 0x2fe   : > { %vm1390_vm14 = vcmp.eq.f32.partialorder %v3799_v43, %v4021_v48  ;;  %1378 = vmin.xlane.f32.xlu0 %v1377_v39  ;;  %v1454_v43 = vand.u32 65535, %v3827_v1  ;;  %v1442_v10 = vcvt.s32.f32 %v1440_v6 }
 0x2ff   : > { %v4026_v31 = vpop.xlane.xlu0 %1402  ;;  %v1391_v29 = vsel %vm1390_vm14, %v1386_v5, inf }
 0x300   : > { %vm1404_vm15 = vcmp.eq.f32.partialorder %v3807_v35, %v4026_v31  ;;  %1392 = vmin.xlane.f32.xlu1 %v1391_v29  ;;  %v1468_v35 = vand.u32 65535, %v3835_v20  ;;  %v1456_v18 = vcvt.s32.f32 %v1454_v43 }
 0x301   : > { %v4031_v32 = vpop.xlane.xlu1 %1416  ;;  %v1405_v56 = vsel %vm1404_vm15, %v1400_v26, inf }
 0x302   : > { %vm1418_vm0 = vcmp.eq.f32.partialorder %v3815_v34, %v4031_v32  ;;  %1406 = vmin.xlane.f32.xlu0 %v1405_v56  ;;  %v1482_v34 = vand.u32 65535, %v3843_v53  ;;  %v1470_v8 = vcvt.s32.f32 %v1468_v35  ;;  %v4463_v35 = vld [vmem:[#allocation35_spill] sm:$0xff] }
 0x303   : > { %v4036_v36 = vpop.xlane.xlu0 %1430  ;;  %v1419_v54 = vsel %vm1418_vm0, %v1414_v22, inf }
 0x304   : > { %vm1432_vm1 = vcmp.eq.f32.partialorder %v3823_v17, %v4036_v36  ;;  %1420 = vmin.xlane.f32.xlu1 %v1419_v54  ;;  %v1496_v17 = vand.u32 65535, %v3851_v25  ;;  %v1484_v41 = vcvt.s32.f32 %v1482_v34  ;;  %v4464_v34 = vld [vmem:[#allocation36_spill] sm:$0xff] }
 0x305   : > { %v4041_v50 = vpop.xlane.xlu1 %1444  ;;  %v1433_v24 = vsel %vm1432_vm1, %v1428_v33, inf }
 0x306   : > { %vm1446_vm3 = vcmp.eq.f32.partialorder %v3831_v15, %v4041_v50  ;;  %1434 = vmin.xlane.f32.xlu0 %v1433_v24  ;;  %v1510_v15 = vand.u32 65535, %v3859_v3  ;;  %v1498_v39 = vcvt.s32.f32 %v1496_v17  ;;  %v4465_v17 = vld [vmem:[#allocation37_spill] sm:$0xff] }
 0x307   : > { %v4046_v1 = vpop.xlane.xlu0 %1458  ;;  %v1447_v55 = vsel %vm1446_vm3, %v1442_v10, inf }
 0x308   : > { %vm1460_vm4 = vcmp.eq.f32.partialorder %v3839_v12, %v4046_v1  ;;  %1448 = vmin.xlane.f32.xlu1 %v1447_v55  ;;  %v1524_v12 = vand.u32 65535, %v3867_v37  ;;  %v1512_v52 = vcvt.s32.f32 %v1510_v15 }
 0x309   : > { %v4051_v20 = vpop.xlane.xlu1 %1472  ;;  %v1461_v62 = vsel %vm1460_vm4, %v1456_v18, inf }
 0x30a   : > { %vm1474_vm5 = vcmp.eq.f32.partialorder %v3847_v11, %v4051_v20  ;;  %1462 = vmin.xlane.f32.xlu0 %v1461_v62  ;;  %v1538_v11 = vand.u32 65535, %v3875_v7  ;;  %v1526_v26 = vcvt.s32.f32 %v1524_v12 }
 0x30b   : > { %v4056_v53 = vpop.xlane.xlu0 %1486  ;;  %v1475_v16 = vsel %vm1474_vm5, %v1470_v8, inf }
 0x30c   : > { %vm1488_vm6 = vcmp.eq.f32.partialorder %v3855_v63, %v4056_v53  ;;  %1476 = vmin.xlane.f32.xlu1 %v1475_v16  ;;  %v1552_v63 = vand.u32 65535, %v3883_v28  ;;  %v1540_v56 = vcvt.s32.f32 %v1538_v11  ;;  %v4466_v16 = vld [vmem:[#allocation38_spill] sm:$0xff] }
 0x30d   : > { %v4061_v25 = vpop.xlane.xlu1 %1500  ;;  %v1489_v42 = vsel %vm1488_vm6, %v1484_v41, inf }
 0x30e   : > { %vm1502_vm7 = vcmp.eq.f32.partialorder %v3863_v61, %v4061_v25  ;;  %1490 = vmin.xlane.f32.xlu0 %v1489_v42  ;;  %v1566_v61 = vand.u32 65535, %v3891_v30  ;;  %v1554_v43 = vcvt.s32.f32 %v1552_v63  ;;  %v4468_v63 = vld [vmem:[#allocation40_spill] sm:$0xff] }
 0x30f   : > { %v4066_v3 = vpop.xlane.xlu0 %1514  ;;  %v1503_v5 = vsel %vm1502_vm7, %v1498_v39, inf  ;;  %v4467_v39 = vld [vmem:[#allocation39_spill] sm:$0xff] }
 0x310   : > { %vm1516_vm8 = vcmp.eq.f32.partialorder %v3871_v58, %v4066_v3  ;;  %1504 = vmin.xlane.f32.xlu1 %v1503_v5  ;;  %v1580_v58 = vand.u32 65535, %v3899_v45  ;;  %v1568_v33 = vcvt.s32.f32 %v1566_v61 }
 0x311   : > { %v4071_v37 = vpop.xlane.xlu1 %1528  ;;  %v1517_v29 = vsel %vm1516_vm8, %v1512_v52, inf }
 0x312   : > { %vm1530_vm9 = vcmp.eq.f32.partialorder %v3879_v57, %v4071_v37  ;;  %1518 = vmin.xlane.f32.xlu0 %v1517_v29  ;;  %v1594_v57 = vand.u32 65535, %v3907_v19  ;;  %v1582_v10 = vcvt.s32.f32 %v1580_v58 }
 0x313   : > { %v4076_v7 = vpop.xlane.xlu0 %1542  ;;  %v1531_v6 = vsel %vm1530_vm9, %v1526_v26, inf }
 0x314   : > { %vm1544_vm10 = vcmp.eq.f32.partialorder %v3887_v46, %v4076_v7  ;;  %1532 = vmin.xlane.f32.xlu1 %v1531_v6  ;;  %v1608_v46 = vand.u32 65535, %v3915_v59  ;;  %v1596_v18 = vcvt.s32.f32 %v1594_v57  ;;  %v1636_v59 = vand.u32 65535, %v3931_v14  ;;  %v4469_v6 = vld [vmem:[#allocation41_spill] sm:$0xff] }
 0x315   : > { %v4081_v28 = vpop.xlane.xlu1 %1556  ;;  %v1545_v22 = vsel %vm1544_vm10, %v1540_v56, inf  ;;  %v1664_v14 = vand.u32 65535, %v3947_v38  ;;  %v1692_v38 = vand.u32 65535, %v3963_v2 }
 0x316   : > { %vm1558_vm11 = vcmp.eq.f32.partialorder %v3895_v44, %v4081_v28  ;;  %1546 = vmin.xlane.f32.xlu0 %v1545_v22  ;;  %v1622_v44 = vand.u32 65535, %v3923_v21  ;;  %v1610_v15 = vcvt.s32.f32 %v1608_v46  ;;  %v1650_v21 = vand.u32 65535, %v3939_v0 }
 0x317   : > { %v4086_v30 = vpop.xlane.xlu0 %1570  ;;  %v1559_v54 = vsel %vm1558_vm11, %v1554_v43, inf  ;;  %v1638_v52 = vcvt.s32.f32 %v1636_v59  ;;  %v1678_v0 = vand.u32 65535, %v3955_v49  ;;  %v1666_v22 = vcvt.s32.f32 %v1664_v14  ;;  %v4470_v43 = vld [vmem:[#allocation42_spill] sm:$0xff] }
 0x318   : > { %vm1572_vm12 = vcmp.eq.f32.partialorder %v4463_v35, %v4086_v30  ;;  %1560 = vmin.xlane.f32.xlu1 %v1559_v54  ;;  %v1624_v42 = vcvt.s32.f32 %v1622_v44  ;;  %v1652_v61 = vcvt.s32.f32 %v1650_v21  ;;  %v1694_v35 = vcvt.s32.f32 %v1692_v38  ;;  %v3220_v44 = vld [vmem:[%s4372_s5 + $0x8] sm:$0xff]  }
 0x319   : > { %v4091_v45 = vpop.xlane.xlu1 %1584  ;;  %v1573_v24 = vsel %vm1572_vm12, %v1568_v33, inf  ;;  %v1680_v57 = vcvt.s32.f32 %v1678_v0  ;;  %v4471_v33 = vld [vmem:[#allocation43_spill] sm:$0xff] }
 0x31a   : > { %vm1586_vm13 = vcmp.eq.f32.partialorder %v4464_v34, %v4091_v45  ;;  %1574 = vmin.xlane.f32.xlu0 %v1573_v24  ;;  %v4472_v24 = vld [vmem:[#allocation44_spill] sm:$0xff]  ;;  %v3219_v34 = vld [vmem:[%s4372_s5] sm:$0xff]  }
 0x31b   : > { %v4096_v19 = vpop.xlane.xlu0 %1598  ;;  %v1587_v55 = vsel %vm1586_vm13, %v1582_v10, inf  ;;  %3155 = vmatprep.subr.bf16.mxu1 %v3219_v34 }
 0x31c   : > { %vm1600_vm14 = vcmp.eq.f32.partialorder %v4465_v17, %v4096_v19  ;;  %1588 = vmin.xlane.f32.xlu1 %v1587_v55  ;;  %3156 = vmatpush3.bf16.msra.mxu1 %v3219_v34  ;;  %v1269_v55 = vcvt.f32.s32 %v3976_v9 }
 0x31d   : > { %v4101_v62 = vpop.xlane.xlu1 %1612  ;;  %v1601_v8 = vsel %vm1600_vm14, %v1596_v18, inf  ;;  %3157 = vmatprep.subr.bf16.mxu1 %v3220_v44  ;;  %v1283_v18 = vcvt.f32.s32 %v3981_v40  ;;  %v1339_v40 = vcvt.f32.s32 %v4001_v51  ;;  %v1367_v51 = vcvt.f32.s32 %v4011_v23 }
 0x31e   : > { %vm1614_vm15 = vcmp.eq.f32.partialorder %v4466_v16, %v4101_v62  ;;  %1602 = vmin.xlane.f32.xlu0 %v1601_v8  ;;  %v1270_v59 = vshll.u32 %v1269_v55, 16  ;;  %v1297_v8 = vcvt.f32.s32 %v3986_v47  ;;  %v1311_v16 = vcvt.f32.s32 %v3991_v4  ;;  %v4473_v47 = vld [vmem:[#allocation34_spill] sm:$0xff] }
 0x31f   : > { %v4106_v41 = vpop.xlane.xlu0 %1626  ;;  %v1615_v12 = vsel %vm1614_vm15, %v1610_v15, inf  ;;  %v1395_v55 = vcvt.f32.s32 %v4021_v48 }
 0x320   : > { %vm1628_vm0 = vcmp.eq.f32.partialorder %v4467_v39, %v4106_v41  ;;  %1616 = vmin.xlane.f32.xlu1 %v1615_v12  ;;  %3158 = vmatpush3.bf16.msra.mxu1 %v3220_v44  ;;  %v1284_v12 = vshll.u32 %v1283_v18, 16  ;;  %v1312_v9 = vshll.u32 %v1311_v16, 16  ;;  %v1368_v44 = vshll.u32 %v1367_v51, 16 }
 0x321   : > { %v4111_v11 = vpop.xlane.xlu1 %1640  ;;  %v1629_v5 = vsel %vm1628_vm0, %v1624_v42, inf }
 0x322   : > { %vm1642_vm1 = vcmp.eq.f32.partialorder %v4468_v63, %v4111_v11  ;;  %1630 = vmin.xlane.f32.xlu0 %v1629_v5  ;;  %v1298_v5 = vshll.u32 %v1297_v8, 16 }
 0x323   : > { %v4116_v29 = vpop.xlane.xlu0 %1654  ;;  %v1643_v26 = vsel %vm1642_vm1, %v1638_v52, inf  ;;  %v1325_v52 = vcvt.f32.s32 %v3996_v13  ;;  %v3229_v13 = vmov 1.0|1.0  }
 0x324   : > { %vm1656_vm3 = vcmp.eq.f32.partialorder %v4469_v6, %v4116_v29  ;;  %1644 = vmin.xlane.f32.xlu1 %v1643_v26 }
 0x325   : > { %v4121_v56 = vpop.xlane.xlu1 %1668  ;;  %v1657_v58 = vsel %vm1656_vm3, %v1652_v61, inf  ;;  %v1326_v38 = vshll.u32 %v1325_v52, 16  ;;  %v1437_v52 = vcvt.f32.s32 %v4036_v36 }
 0x326   : > { %vm1670_vm4 = vcmp.eq.f32.partialorder %v4470_v43, %v4121_v56  ;;  %1658 = vmin.xlane.f32.xlu0 %v1657_v58  ;;  %v1353_v58 = vcvt.f32.s32 %v4006_v60  ;;  %v1381_v60 = vcvt.f32.s32 %v4016_v27 }
 0x327   : > { %v4125_v49 = vpop.xlane.xlu0 %1682  ;;  %v1671_v54 = vsel %vm1670_vm4, %v1666_v22, inf }
 0x328   : > { %vm1684_vm5 = vcmp.eq.f32.partialorder %v4471_v33, %v4125_v49  ;;  %1672 = vmin.xlane.f32.xlu1 %v1671_v54  ;;  %v1382_v8 = vshll.u32 %v1381_v60, 16 }
 0x329   : > { %v4129_v46 = vpop.xlane.xlu1 %1696  ;;  %v1685_v2 = vsel %vm1684_vm5, %v1680_v57, inf  ;;  %v1340_v57 = vshll.u32 %v1339_v40, 16 }
 0x32a   : > { %vm1698_vm6 = vcmp.eq.f32.partialorder %v4472_v24, %v4129_v46  ;;  %1686 = vmin.xlane.f32.xlu0 %v1685_v2  ;;  %v1354_v24 = vshll.u32 %v1353_v58, 16 }
 0x32b   : > { %v1699_v10 = vsel %vm1698_vm6, %v1694_v35, inf }
 0x32c   : > { %1700 = vmin.xlane.f32.xlu1 %v1699_v10 }
 0x37b   : > { %v1267_v17 = vpop.xlane.xlu0 %1266 }
 0x37c   : > { %v1268_v15 = vcvt.f32.s32 %v1267_v17 }
 0x37d   : > { %v1281_v21 = vpop.xlane.xlu1 %1280 }
 0x37e   : > { %v1271_v42 = vadd.s32 %v1270_v59, %v1268_v15  ;;  %v1282_v39 = vcvt.f32.s32 %v1281_v21  ;;  %v1409_v15 = vcvt.f32.s32 %v4026_v31  ;;  %v1396_v21 = vshll.u32 %v1395_v55, 16 }
 0x37f   : > { %v1295_v14 = vpop.xlane.xlu0 %1294  ;;  %v1521_v55 = vcvt.f32.s32 %v4066_v3 }
 0x380   : > { %v1285_v63 = vadd.s32 %v1284_v12, %v1282_v39  ;;  %v1296_v0 = vcvt.f32.s32 %v1295_v14  ;;  %vm1706_vm7 = vcmp.eq.s32.totalorder %v4473_v47, %v1271_v42  ;;  %v1423_v12 = vcvt.f32.s32 %v4031_v32 }
 0x381   : > { %v1309_v26 = vpop.xlane.xlu1 %1308 }
 0x382   : > { %v1299_v61 = vadd.s32 %v1298_v5, %v1296_v0  ;;  %v1310_v6 = vcvt.f32.s32 %v1309_v26  ;;  %vm1707_vm8 = vcmp.eq.s32.totalorder %v4473_v47, %v1285_v63  ;;  %v1410_v5 = vshll.u32 %v1409_v15, 16 }
 0x383   : > { %v1323_v4 = vpop.xlane.xlu0 %1322  ;;  %vm2766_vm9 = vmpackc.low %vm1707_vm8, %vm1706_vm7  ;;  %v1424_v0 = vshll.u32 %v1423_v12, 16 }
 0x384   : > { %v1313_v22 = vadd.s32 %v1312_v9, %v1310_v6  ;;  %v1324_v43 = vcvt.f32.s32 %v1323_v4  ;;  %3123 = vmatprep.mubr.msk.bf16.mxu0 %vm2766_vm9, %v3229_v13  ;;  %vm1708_vm10 = vcmp.eq.s32.totalorder %v4473_v47, %v1299_v61  ;;  %v1451_v9 = vcvt.f32.s32 %v4041_v50 }
 0x385   : > { %v1337_v54 = vpop.xlane.xlu1 %1336  ;;  %v1438_v6 = vshll.u32 %v1437_v52, 16  ;;  %v1465_v4 = vcvt.f32.s32 %v4046_v1  ;;  %v1577_v52 = vcvt.f32.s32 %v4086_v30 }
 0x386   : > { %vm1709_vm11 = vcmp.eq.s32.totalorder %v4473_v47, %v1313_v22  ;;  %v1327_v33 = vadd.s32 %v1326_v38, %v1324_v43  ;;  %v1338_v35 = vcvt.f32.s32 %v1337_v54  ;;  %v1452_v58 = vshll.u32 %v1451_v9, 16 }
 0x387   : > { %vm2768_vm12 = vmpackc.low %vm1709_vm11, %vm1708_vm10  ;;  %v1351_v2 = vpop.xlane.xlu0 %1350  ;;  %v1479_v22 = vcvt.f32.s32 %v4051_v20  ;;  %v1466_v54 = vshll.u32 %v1465_v4, 16 }
 0x388   : > { %v1341_v10 = vadd.s32 %v1340_v57, %v1338_v35  ;;  %v1352_v34 = vcvt.f32.s32 %v1351_v2  ;;  %3124 = vmatmul.mubr.msk.bf16.vlgmr.msra.gmra.mrb[32].mxu0 %vm2768_vm12, %v3229_v13  ;;  %vm1710_vm13 = vcmp.eq.s32.totalorder %v4473_v47, %v1327_v33  ;;  %v1493_v33 = vcvt.f32.s32 %v4056_v53 }
 0x389   : > { %v1365_v23 = vpop.xlane.xlu1 %1364  ;;  %v1480_v2 = vshll.u32 %v1479_v22, 16 }
 0x38a   : > { %v1355_v18 = vadd.s32 %v1354_v24, %v1352_v34  ;;  %v1366_v17 = vcvt.f32.s32 %v1365_v23  ;;  %vm1711_vm14 = vcmp.eq.s32.totalorder %v4473_v47, %v1341_v10  ;;  %v1507_v24 = vcvt.f32.s32 %v4061_v25 }
 0x38b   : > { %v1379_v59 = vpop.xlane.xlu0 %1378  ;;  %vm2770_vm15 = vmpackc.low %vm1711_vm14, %vm1710_vm13 }
 0x38c   : > { %v1369_v27 = vadd.s32 %v1368_v44, %v1366_v17  ;;  %v1380_v16 = vcvt.f32.s32 %v1379_v59  ;;  %3127 = vmatprep.mubr.msk.bf16.mxu0 %vm2770_vm15, %v3229_v13  ;;  %vm1712_vm0 = vcmp.eq.s32.totalorder %v4473_v47, %v1355_v18  ;;  %v1494_v44 = vshll.u32 %v1493_v33, 16 }
 0x38d   : > { %v1393_v48 = vpop.xlane.xlu1 %1392  ;;  %v1508_v18 = vshll.u32 %v1507_v24, 16  ;;  %v1535_v17 = vcvt.f32.s32 %v4071_v37  ;;  %v1661_v24 = vcvt.f32.s32 %v4116_v29 }
 0x38e   : > { %v1383_v42 = vadd.s32 %v1382_v8, %v1380_v16  ;;  %v1394_v39 = vcvt.f32.s32 %v1393_v48  ;;  %vm1713_vm1 = vcmp.eq.s32.totalorder %v4473_v47, %v1369_v27  ;;  %v1522_v27 = vshll.u32 %v1521_v55, 16 }
 0x38f   : > { %v1407_v14 = vpop.xlane.xlu0 %1406  ;;  %vm2772_vm3 = vmpackc.low %vm1713_vm1, %vm1712_vm0  ;;  %v1549_v16 = vcvt.f32.s32 %v4076_v7  ;;  %v1536_v12 = vshll.u32 %v1535_v17, 16  ;;  %v1563_v48 = vcvt.f32.s32 %v4081_v28 }
 0x390   : > { %v1397_v31 = vadd.s32 %v1396_v21, %v1394_v39  ;;  %v1408_v63 = vcvt.f32.s32 %v1407_v14  ;;  %3128 = vmatmul.mubr.msk.bf16.gmra.mrb[36].mxu0 %vm2772_vm3, %v3229_v13  ;;  %vm1714_vm4 = vcmp.eq.s32.totalorder %v4473_v47, %v1383_v42 }
 0x391   : > { %v1421_v32 = vpop.xlane.xlu1 %1420 }
 0x392   : > { %v1411_v40 = vadd.s32 %v1410_v5, %v1408_v63  ;;  %v1422_v26 = vcvt.f32.s32 %v1421_v32  ;;  %vm1715_vm5 = vcmp.eq.s32.totalorder %v4473_v47, %v1397_v31  ;;  %v1550_v5 = vshll.u32 %v1549_v16, 16 }
 0x393   : > { %v1435_v61 = vpop.xlane.xlu0 %1434  ;;  %vm2774_vm6 = vmpackc.low %vm1715_vm5, %vm1714_vm4  ;;  %v1564_v63 = vshll.u32 %v1563_v48, 16 }
 0x394   : > { %v1425_v36 = vadd.s32 %v1424_v0, %v1422_v26  ;;  %v1436_v38 = vcvt.f32.s32 %v1435_v61  ;;  %3131 = vmatprep.mubr.msk.bf16.mxu0 %vm2774_vm6, %v3229_v13  ;;  %vm1716_vm7 = vcmp.eq.s32.totalorder %v4473_v47, %v1411_v40  ;;  %v1591_v0 = vcvt.f32.s32 %v4091_v45 }
 0x395   : > { %v1449_v50 = vpop.xlane.xlu1 %1448  ;;  %v1578_v26 = vshll.u32 %v1577_v52, 16  ;;  %v1605_v61 = vcvt.f32.s32 %v4096_v19 }
 0x396   : > { %v1439_v43 = vadd.s32 %v1438_v6, %v1436_v38  ;;  %v1450_v57 = vcvt.f32.s32 %v1449_v50  ;;  %vm1717_vm8 = vcmp.eq.s32.totalorder %v4473_v47, %v1425_v36  ;;  %v1592_v4 = vshll.u32 %v1591_v0, 16 }
 0x397   : > { %v1463_v51 = vpop.xlane.xlu0 %1462  ;;  %vm2776_vm9 = vmpackc.low %vm1717_vm8, %vm1716_vm7  ;;  %v1619_v36 = vcvt.f32.s32 %v4101_v62  ;;  %v1606_v50 = vshll.u32 %v1605_v61, 16 }
 0x398   : > { %v1453_v1 = vadd.s32 %v1452_v58, %v1450_v57  ;;  %v1464_v35 = vcvt.f32.s32 %v1463_v51  ;;  %3132 = vmatmul.mubr.msk.bf16.gmra.mrb[40].mxu0 %vm2776_vm9, %v3229_v13  ;;  %vm1718_vm10 = vcmp.eq.s32.totalorder %v4473_v47, %v1439_v43  ;;  %v1633_v43 = vcvt.f32.s32 %v4106_v41 }
 0x399   : > { %v1477_v20 = vpop.xlane.xlu1 %1476  ;;  %v1620_v51 = vshll.u32 %v1619_v36, 16 }
 0x39a   : > { %v1467_v60 = vadd.s32 %v1466_v54, %v1464_v35  ;;  %v1478_v10 = vcvt.f32.s32 %v1477_v20  ;;  %vm1719_vm11 = vcmp.eq.s32.totalorder %v4473_v47, %v1453_v1  ;;  %v1647_v54 = vcvt.f32.s32 %v4111_v11 }
 0x39b   : > { %v1491_v34 = vpop.xlane.xlu0 %1490  ;;  %vm2778_vm12 = vmpackc.low %vm1719_vm11, %vm1718_vm10 }
 0x39c   : > { %v1481_v53 = vadd.s32 %v1480_v2, %v1478_v10  ;;  %v1492_v23 = vcvt.f32.s32 %v1491_v34  ;;  %3135 = vmatprep.mubr.msk.bf16.mxu0 %vm2778_vm12, %v3229_v13  ;;  %vm1720_vm13 = vcmp.eq.s32.totalorder %v4473_v47, %v1467_v60  ;;  %v1634_v2 = vshll.u32 %v1633_v43, 16 }
 0x39d   : > { %v1505_v25 = vpop.xlane.xlu1 %1504  ;;  %v1648_v60 = vshll.u32 %v1647_v54, 16  ;;  %v1675_v10 = vcvt.f32.s32 %v4121_v56 }
 0x39e   : > { %v1495_v59 = vadd.s32 %v1494_v44, %v1492_v23  ;;  %v1506_v8 = vcvt.f32.s32 %v1505_v25  ;;  %vm1721_vm14 = vcmp.eq.s32.totalorder %v4473_v47, %v1481_v53  ;;  %v1662_v53 = vshll.u32 %v1661_v24, 16 }
 0x39f   : > { %v1519_v15 = vpop.xlane.xlu0 %1518  ;;  %vm2780_vm15 = vmpackc.low %vm1721_vm14, %vm1720_vm13  ;;  %v1689_v23 = vcvt.f32.s32 %v4125_v49  ;;  %v1676_v17 = vshll.u32 %v1675_v10, 16  ;;  %v1703_v25 = vcvt.f32.s32 %v4129_v46 }
 0x3a0   : > { %v1509_v3 = vadd.s32 %v1508_v18, %v1506_v8  ;;  %v1520_v21 = vcvt.f32.s32 %v1519_v15  ;;  %3136 = vmatmul.mubr.msk.bf16.gmra.mrb[44].mxu0 %vm2780_vm15, %v3229_v13  ;;  %vm1722_vm0 = vcmp.eq.s32.totalorder %v4473_v47, %v1495_v59 }
 0x3a1   : > { %v1533_v37 = vpop.xlane.xlu1 %1532  ;;  %v1704_v49 = vshll.u32 %v1703_v25, 16 }
 0x3a2   : > { %v1523_v42 = vadd.s32 %v1522_v27, %v1520_v21  ;;  %v1534_v39 = vcvt.f32.s32 %v1533_v37  ;;  %vm1723_vm1 = vcmp.eq.s32.totalorder %v4473_v47, %v1509_v3  ;;  %v1690_v27 = vshll.u32 %v1689_v23, 16 }
 0x3a3   : > { %v1547_v14 = vpop.xlane.xlu0 %1546  ;;  %vm2782_vm3 = vmpackc.low %vm1723_vm1, %vm1722_vm0 }
 0x3a4   : > { %v1537_v7 = vadd.s32 %v1536_v12, %v1534_v39  ;;  %v1548_v31 = vcvt.f32.s32 %v1547_v14  ;;  %3139 = vmatprep.mubr.msk.bf16.mxu0 %vm2782_vm3, %v3229_v13  ;;  %vm1724_vm4 = vcmp.eq.s32.totalorder %v4473_v47, %v1523_v42  ;;  %v4474_v39 = vld [vmem:[#allocation2_spill] sm:$0xff] }
 0x3a5   : > { %v1561_v28 = vpop.xlane.xlu1 %1560 }
 0x3a6   : > { %v1551_v9 = vadd.s32 %v1550_v5, %v1548_v31  ;;  %v1562_v32 = vcvt.f32.s32 %v1561_v28  ;;  %vm1725_vm5 = vcmp.eq.s32.totalorder %v4473_v47, %v1537_v7  ;;  %v4475_v5 = vld [vmem:[#allocation3_spill] sm:$0xff]  ;;  %v4476_v31 = vld [vmem:[#allocation4_spill] sm:$0xff] }
 0x3a7   : > { %v1575_v40 = vpop.xlane.xlu0 %1574  ;;  %vm2784_vm6 = vmpackc.low %vm1725_vm5, %vm1724_vm4 }
 0x3a8   : > { %v1565_v30 = vadd.s32 %v1564_v63, %v1562_v32  ;;  %v1576_v6 = vcvt.f32.s32 %v1575_v40  ;;  %3140 = vmatmul.mubr.msk.bf16.gmra.mrb[48].mxu0 %vm2784_vm6, %v3229_v13  ;;  %vm1726_vm7 = vcmp.eq.s32.totalorder %v4473_v47, %v1551_v9  ;;  %v4477_v32 = vld [vmem:[#allocation5_spill] sm:$0xff] }
 0x3a9   : > { %v1589_v45 = vpop.xlane.xlu1 %1588 }
 0x3aa   : > { %v1579_v38 = vadd.s32 %v1578_v26, %v1576_v6  ;;  %v1590_v58 = vcvt.f32.s32 %v1589_v45  ;;  %vm1727_vm8 = vcmp.eq.s32.totalorder %v4473_v47, %v1565_v30  ;;  %v4478_v45 = vld [vmem:[#allocation6_spill] sm:$0xff] }
 0x3ab   : > { %v1603_v22 = vpop.xlane.xlu0 %1602  ;;  %vm2786_vm9 = vmpackc.low %vm1727_vm8, %vm1726_vm7 }
 0x3ac   : > { %v1593_v19 = vadd.s32 %v1592_v4, %v1590_v58  ;;  %v1604_v57 = vcvt.f32.s32 %v1603_v22  ;;  %3143 = vmatprep.mubr.msk.bf16.mxu0 %vm2786_vm9, %v3229_v13  ;;  %vm1728_vm10 = vcmp.eq.s32.totalorder %v4473_v47, %v1579_v38  ;;  %v4479_v58 = vld [vmem:[#allocation7_spill] sm:$0xff] }
 0x3ad   : > { %v1617_v62 = vpop.xlane.xlu1 %1616 }
 0x3ae   : > { %v1607_v33 = vadd.s32 %v1606_v50, %v1604_v57  ;;  %v1618_v1 = vcvt.f32.s32 %v1617_v62  ;;  %vm1729_vm11 = vcmp.eq.s32.totalorder %v4473_v47, %v1593_v19  ;;  %v4480_v62 = vld [vmem:[#allocation8_spill] sm:$0xff] }
 0x3af   : > { %v1631_v35 = vpop.xlane.xlu0 %1630  ;;  %vm2788_vm12 = vmpackc.low %vm1729_vm11, %vm1728_vm10 }
 0x3b0   : > { %v1621_v41 = vadd.s32 %v1620_v51, %v1618_v1  ;;  %v1632_v20 = vcvt.f32.s32 %v1631_v35  ;;  %3144 = vmatmul.mubr.msk.bf16.gmra.mrb[52].mxu0 %vm2788_vm12, %v3229_v13  ;;  %vm1730_vm13 = vcmp.eq.s32.totalorder %v4473_v47, %v1607_v33  ;;  %v4481_v1 = vld [vmem:[#allocation9_spill] sm:$0xff] }
 0x3b1   : > { %v1645_v11 = vpop.xlane.xlu1 %1644 }
 0x3b2   : > { %v1635_v34 = vadd.s32 %v1634_v2, %v1632_v20  ;;  %v1646_v44 = vcvt.f32.s32 %v1645_v11  ;;  %vm1731_vm14 = vcmp.eq.s32.totalorder %v4473_v47, %v1621_v41 }
 0x3b3   : > { %v1659_v55 = vpop.xlane.xlu0 %1658  ;;  %vm2790_vm15 = vmpackc.low %vm1731_vm14, %vm1730_vm13 }
 0x3b4   : > { %v1649_v29 = vadd.s32 %v1648_v60, %v1646_v44  ;;  %v1660_v18 = vcvt.f32.s32 %v1659_v55  ;;  %3147 = vmatprep.mubr.msk.bf16.mxu0 %vm2790_vm15, %v3229_v13  ;;  %vm1732_vm0 = vcmp.eq.s32.totalorder %v4473_v47, %v1635_v34  ;;  %v4482_v44 = vld [vmem:[#allocation10_spill] sm:$0xff] }
 0x3b5   : > { %v1673_v56 = vpop.xlane.xlu1 %1672 }
 0x3b6   : > { %v1663_v59 = vadd.s32 %v1662_v53, %v1660_v18  ;;  %v1674_v8 = vcvt.f32.s32 %v1673_v56  ;;  %vm1733_vm1 = vcmp.eq.s32.totalorder %v4473_v47, %v1649_v29  ;;  %v4483_v53 = vld [vmem:[#allocation11_spill] sm:$0xff] }
 0x3b7   : > { %v1687_v15 = vpop.xlane.xlu0 %1686  ;;  %vm2792_vm3 = vmpackc.low %vm1733_vm1, %vm1732_vm0 }
 0x3b8   : > { %v1677_v16 = vadd.s32 %v1676_v17, %v1674_v8  ;;  %v1688_v3 = vcvt.f32.s32 %v1687_v15  ;;  %3148 = vmatmul.mubr.msk.bf16.gmra.mrb[56].mxu0 %vm2792_vm3, %v3229_v13  ;;  %vm1734_vm4 = vcmp.eq.s32.totalorder %v4473_v47, %v1663_v59  ;;  %v4484_v17 = vld [vmem:[#allocation12_spill] sm:$0xff]  ;;  %v4485_v15 = vld [vmem:[#allocation13_spill] sm:$0xff] }
 0x3b9   : > { %v1701_v21 = vpop.xlane.xlu1 %1700 }
 0x3ba   : > { %v1691_v12 = vadd.s32 %v1690_v27, %v1688_v3  ;;  %v1702_v48 = vcvt.f32.s32 %v1701_v21  ;;  %vm1735_vm5 = vcmp.eq.s32.totalorder %v4473_v47, %v1677_v16 }
 0x3bb   : > { %vm2794_vm6 = vmpackc.low %vm1735_vm5, %vm1734_vm4 }
 0x3bc   : > { %v1705_v46 = vadd.s32 %v1704_v49, %v1702_v48  ;;  %3151 = vmatprep.mubr.msk.bf16.mxu0 %vm2794_vm6, %v3229_v13  ;;  %vm1736_vm7 = vcmp.eq.s32.totalorder %v4473_v47, %v1691_v12 }
 0x3be   : > { %vm1737_vm8 = vcmp.eq.s32.totalorder %v4473_v47, %v1705_v46 }
 0x3bf   : > { %vm2796_vm9 = vmpackc.low %vm1737_vm8, %vm1736_vm7 }
 0x3c0   : > { %3152 = vmatmul.mubr.msk.bf16.gmra.mrb[60].mxu0 %vm2796_vm9, %v3229_v13 }
 0x45b   : > { %v3125_v37 = vpop.f32.mrb[32].mxu0 }
 0x45c   : > { %v1852_v42 = vpop.f32.mrb[33].mxu0  ;;  %v1981_v14 = vsub.f32 %v3125_v37, %v4474_v39  ;;  %v4486_v39 = vld [vmem:[#allocation14_spill] sm:$0xff] }
 0x45d   : > { %v1979_v52 = vsub.f32 %v1852_v42, %v4475_v5  ;;  %v3126_v7 = vpop.f32.mrb[34].mxu0  ;;  %v4487_v5 = vld [vmem:[#allocation15_spill] sm:$0xff] }
 0x45e   : > { %v1982_v63 = vsub.f32 %v3126_v7, %v4476_v31  ;;  %v2178_v0 = vpack.c.bf16 %v3126_v7, %v3125_v37  ;;  %v1855_v28 = vpop.f32.mrb[35].mxu0  ;;  %v2013_v61 = vmul.f32 %v1981_v14, %v1981_v14 }
 0x45f   : > { %v2011_v9 = vmul.f32 %v1979_v52, %v1979_v52  ;;  %v1980_v40 = vsub.f32 %v1855_v28, %v4477_v32  ;;  %v2177_v26 = vpack.c.bf16 %v1855_v28, %v1852_v42  ;;  %v4488_v32 = vld [vmem:[#allocation16_spill] sm:$0xff] }
 0x460   : > { %v2014_v30 = vmul.f32 %v1982_v63, %v1982_v63  ;;  %v2049_v43 = vsel %vm687_vm2, %v2013_v61, 0.0 }
 0x461   : > { %v2012_v47 = vmul.f32 %v1980_v40, %v1980_v40  ;;  %3159 = vmatprep.mubr.msk.bf16.mxu1 %vm687_vm2, %v2177_v26  ;;  %v2043_v13 = vsel %vm687_vm2, %v2011_v9, 0.0  ;;  %v4489_v26 = vld [vmem:[#allocation17_spill] sm:$0xff] }
 0x462   : > { %2044 = vadd.xlane.f32.xlu0 %v2043_v13  ;;  %3160 = vmatmul.mubr.msk.bf16.vlgmr.msra.gmra.mrb[32].mxu1 %vm687_vm2, %v2178_v0  ;;  %v2052_v51 = vsel %vm687_vm2, %v2014_v30, 0.0 }
 0x463   : > { %v3129_v6 = vpop.f32.mrb[36].mxu0  ;;  %v2046_v4 = vsel %vm687_vm2, %v2012_v47, 0.0 }
 0x464   : > { %2047 = vadd.xlane.f32.xlu1 %v2046_v4  ;;  %v1868_v36 = vpop.f32.mrb[37].mxu0  ;;  %v1985_v38 = vsub.f32 %v3129_v6, %v4478_v45 }
 0x465   : > { %v1983_v22 = vsub.f32 %v1868_v36, %v4479_v58  ;;  %v3130_v50 = vpop.f32.mrb[38].mxu0  ;;  %v4490_v58 = vld [vmem:[#allocation18_spill] sm:$0xff] }
 0x466   : > { %v2180_v19 = vpack.c.bf16 %v3130_v50, %v3129_v6  ;;  %2050 = vadd.xlane.f32.xlu0 %v2049_v43  ;;  %v1871_v57 = vpop.f32.mrb[39].mxu0  ;;  %v1986_v33 = vsub.f32 %v3130_v50, %v4480_v62  ;;  %v2017_v24 = vmul.f32 %v1985_v38, %v1985_v38  ;;  %v4491_v50 = vld [vmem:[#allocation19_spill] sm:$0xff] }
 0x467   : > { %v2015_v54 = vmul.f32 %v1983_v22, %v1983_v22  ;;  %v1984_v35 = vsub.f32 %v1871_v57, %v4481_v1  ;;  %v2179_v2 = vpack.c.bf16 %v1871_v57, %v1868_v36 }
 0x468   : > { %2053 = vadd.xlane.f32.xlu1 %v2052_v51  ;;  %v2018_v60 = vmul.f32 %v1986_v33, %v1986_v33  ;;  %v2061_v18 = vsel %vm687_vm2, %v2017_v24, 0.0  ;;  %v4492_v51 = vld [vmem:[#allocation20_spill] sm:$0xff] }
 0x469   : > { %v2016_v41 = vmul.f32 %v1984_v35, %v1984_v35  ;;  %3163 = vmatprep.mubr.msk.bf16.mxu1 %vm687_vm2, %v2179_v2  ;;  %v2055_v20 = vsel %vm687_vm2, %v2015_v54, 0.0  ;;  %v4493_v35 = vld [vmem:[#allocation21_spill] sm:$0xff] }
 0x46a   : > { %2056 = vadd.xlane.f32.xlu0 %v2055_v20  ;;  %3164 = vmatmul.mubr.msk.bf16.gmra.mrb[36].mxu1 %vm687_vm2, %v2180_v19  ;;  %v2064_v3 = vsel %vm687_vm2, %v2018_v60, 0.0 }
 0x46b   : > { %v3133_v10 = vpop.f32.mrb[40].mxu0  ;;  %v2058_v11 = vsel %vm687_vm2, %v2016_v41, 0.0 }
 0x46c   : > { %2059 = vadd.xlane.f32.xlu1 %v2058_v11  ;;  %v1884_v34 = vpop.f32.mrb[41].mxu0  ;;  %v1989_v55 = vsub.f32 %v3133_v10, %v4482_v44 }
 0x46d   : > { %v1987_v23 = vsub.f32 %v1884_v34, %v4483_v53  ;;  %v3134_v29 = vpop.f32.mrb[42].mxu0  ;;  %v4494_v53 = vld [vmem:[#allocation22_spill] sm:$0xff] }
 0x46e   : > { %v1990_v25 = vsub.f32 %v3134_v29, %v4484_v17  ;;  %v2182_v56 = vpack.c.bf16 %v3134_v29, %v3133_v10  ;;  %2062 = vadd.xlane.f32.xlu0 %v2061_v18  ;;  %v1887_v59 = vpop.f32.mrb[43].mxu0  ;;  %v2021_v49 = vmul.f32 %v1989_v55, %v1989_v55  ;;  %v4495_v29 = vld [vmem:[#allocation23_spill] sm:$0xff] }
 0x46f   : > { %v2019_v8 = vmul.f32 %v1987_v23, %v1987_v23  ;;  %v1988_v27 = vsub.f32 %v1887_v59, %v4485_v15  ;;  %v2181_v16 = vpack.c.bf16 %v1887_v59, %v1884_v34 }
 0x470   : > { %2065 = vadd.xlane.f32.xlu1 %v2064_v3  ;;  %v2022_v48 = vmul.f32 %v1990_v25, %v1990_v25  ;;  %v2073_v31 = vsel %vm687_vm2, %v2021_v49, 0.0  ;;  %v4497_v3 = vld [vmem:[#allocation25_spill] sm:$0xff] }
 0x471   : > { %v2020_v21 = vmul.f32 %v1988_v27, %v1988_v27  ;;  %3167 = vmatprep.mubr.msk.bf16.mxu1 %vm687_vm2, %v2181_v16  ;;  %v2067_v12 = vsel %vm687_vm2, %v2019_v8, 0.0  ;;  %v4496_v27 = vld [vmem:[#allocation24_spill] sm:$0xff] }
 0x472   : > { %2068 = vadd.xlane.f32.xlu0 %v2067_v12  ;;  %3168 = vmatmul.mubr.msk.bf16.gmra.mrb[40].mxu1 %vm687_vm2, %v2182_v56  ;;  %v2076_v28 = vsel %vm687_vm2, %v2022_v48, 0.0 }
 0x473   : > { %v3137_v46 = vpop.f32.mrb[44].mxu0  ;;  %v2070_v37 = vsel %vm687_vm2, %v2020_v21, 0.0 }
 0x474   : > { %2071 = vadd.xlane.f32.xlu1 %v2070_v37  ;;  %v1900_v42 = vpop.f32.mrb[45].mxu0  ;;  %v1993_v14 = vsub.f32 %v3137_v46, %v4486_v39 }
 0x475   : > { %v1991_v52 = vsub.f32 %v1900_v42, %v4487_v5  ;;  %v3138_v7 = vpop.f32.mrb[46].mxu0  ;;  %v4498_v5 = vld [vmem:[#allocation26_spill] sm:$0xff] }
 0x476   : > { %v2184_v63 = vpack.c.bf16 %v3138_v7, %v3137_v46  ;;  %2074 = vadd.xlane.f32.xlu0 %v2073_v31  ;;  %v1903_v0 = vpop.f32.mrb[47].mxu0  ;;  %v1994_v40 = vsub.f32 %v3138_v7, %v4488_v32  ;;  %v2025_v13 = vmul.f32 %v1993_v14, %v1993_v14  ;;  %v4499_v7 = vld [vmem:[#allocation27_spill] sm:$0xff] }
 0x477   : > { %v2023_v9 = vmul.f32 %v1991_v52, %v1991_v52  ;;  %v1992_v61 = vsub.f32 %v1903_v0, %v4489_v26  ;;  %v2183_v47 = vpack.c.bf16 %v1903_v0, %v1900_v42 }
 0x478   : > { %2077 = vadd.xlane.f32.xlu1 %v2076_v28  ;;  %v2026_v4 = vmul.f32 %v1994_v40, %v1994_v40  ;;  %v2085_v57 = vsel %vm687_vm2, %v2025_v13, 0.0  ;;  %v4500_v28 = vld [vmem:[#allocation28_spill] sm:$0xff] }
 0x479   : > { %v2024_v30 = vmul.f32 %v1992_v61, %v1992_v61  ;;  %3171 = vmatprep.mubr.msk.bf16.mxu1 %vm687_vm2, %v2183_v47  ;;  %v2079_v6 = vsel %vm687_vm2, %v2023_v9, 0.0  ;;  %v4501_v61 = vld [vmem:[#allocation29_spill] sm:$0xff] }
 0x47a   : > { %2080 = vadd.xlane.f32.xlu0 %v2079_v6  ;;  %3172 = vmatmul.mubr.msk.bf16.gmra.mrb[44].mxu1 %vm687_vm2, %v2184_v63  ;;  %v2088_v41 = vsel %vm687_vm2, %v2026_v4, 0.0 }
 0x47b   : > { %v3141_v36 = vpop.f32.mrb[48].mxu0  ;;  %v2082_v45 = vsel %vm687_vm2, %v2024_v30, 0.0 }
 0x47c   : > { %2083 = vadd.xlane.f32.xlu1 %v2082_v45  ;;  %v1916_v38 = vpop.f32.mrb[49].mxu0  ;;  %v1997_v22 = vsub.f32 %v3141_v36, %v4490_v58 }
 0x47d   : > { %v1995_v43 = vsub.f32 %v1916_v38, %v4491_v50  ;;  %v3142_v19 = vpop.f32.mrb[50].mxu0  ;;  %v4502_v50 = vld [vmem:[#allocation30_spill] sm:$0xff] }
 0x47e   : > { %v1998_v54 = vsub.f32 %v3142_v19, %v4492_v51  ;;  %v2186_v62 = vpack.c.bf16 %v3142_v19, %v3141_v36  ;;  %2086 = vadd.xlane.f32.xlu0 %v2085_v57  ;;  %v1919_v33 = vpop.f32.mrb[51].mxu0  ;;  %v2029_v20 = vmul.f32 %v1997_v22, %v1997_v22  ;;  %v4503_v19 = vld [vmem:[#allocation31_spill] sm:$0xff] }
 0x47f   : > { %v2027_v1 = vmul.f32 %v1995_v43, %v1995_v43  ;;  %v1996_v2 = vsub.f32 %v1919_v33, %v4493_v35  ;;  %v2185_v24 = vpack.c.bf16 %v1919_v33, %v1916_v38 }
 0x480   : > { %2089 = vadd.xlane.f32.xlu1 %v2088_v41  ;;  %v2030_v11 = vmul.f32 %v1998_v54, %v1998_v54  ;;  %v2097_v25 = vsel %vm687_vm2, %v2029_v20, 0.0  ;;  %v4505_v41 = vld [vmem:[#allocation33_spill] sm:$0xff] }
 0x481   : > { %v2028_v60 = vmul.f32 %v1996_v2, %v1996_v2  ;;  %3175 = vmatprep.mubr.msk.bf16.mxu1 %vm687_vm2, %v2185_v24  ;;  %v2091_v10 = vsel %vm687_vm2, %v2027_v1, 0.0  ;;  %v4504_v2 = vld [vmem:[#allocation32_spill] sm:$0xff] }
 0x482   : > { %2092 = vadd.xlane.f32.xlu0 %v2091_v10  ;;  %3176 = vmatmul.mubr.msk.bf16.gmra.mrb[48].mxu1 %vm687_vm2, %v2186_v62  ;;  %v2100_v8 = vsel %vm687_vm2, %v2030_v11, 0.0 }
 0x483   : > { %v3145_v34 = vpop.f32.mrb[52].mxu0  ;;  %v2094_v44 = vsel %vm687_vm2, %v2028_v60, 0.0 }
 0x484   : > { %2095 = vadd.xlane.f32.xlu1 %v2094_v44  ;;  %v1932_v55 = vpop.f32.mrb[53].mxu0  ;;  %v2001_v23 = vsub.f32 %v3145_v34, %v4494_v53 }
 0x485   : > { %v1999_v18 = vsub.f32 %v1932_v55, %v4495_v29  ;;  %v3146_v17 = vpop.f32.mrb[54].mxu0 }
 0x486   : > { %v2188_v56 = vpack.c.bf16 %v3146_v17, %v3145_v34  ;;  %2098 = vadd.xlane.f32.xlu0 %v2097_v25  ;;  %v1935_v59 = vpop.f32.mrb[55].mxu0  ;;  %v2002_v16 = vsub.f32 %v3146_v17, %v4496_v27  ;;  %v2033_v12 = vmul.f32 %v2001_v23, %v2001_v23 }
 0x487   : > { %v2031_v15 = vmul.f32 %v1999_v18, %v1999_v18  ;;  %v2000_v49 = vsub.f32 %v1935_v59, %v4497_v3  ;;  %v2187_v21 = vpack.c.bf16 %v1935_v59, %v1932_v55 }
 0x488   : > { %2101 = vadd.xlane.f32.xlu1 %v2100_v8  ;;  %v2034_v37 = vmul.f32 %v2002_v16, %v2002_v16  ;;  %v2109_v0 = vsel %vm687_vm2, %v2033_v12, 0.0 }
 0x489   : > { %v2032_v48 = vmul.f32 %v2000_v49, %v2000_v49  ;;  %3179 = vmatprep.mubr.msk.bf16.mxu1 %vm687_vm2, %v2187_v21  ;;  %v2103_v46 = vsel %vm687_vm2, %v2031_v15, 0.0 }
 0x48a   : > { %2104 = vadd.xlane.f32.xlu0 %v2103_v46  ;;  %3180 = vmatmul.mubr.msk.bf16.gmra.mrb[52].mxu1 %vm687_vm2, %v2188_v56  ;;  %v2112_v30 = vsel %vm687_vm2, %v2034_v37, 0.0 }
 0x48b   : > { %v3149_v42 = vpop.f32.mrb[56].mxu0  ;;  %v2106_v39 = vsel %vm687_vm2, %v2032_v48, 0.0 }
 0x48c   : > { %2107 = vadd.xlane.f32.xlu1 %v2106_v39  ;;  %v1948_v14 = vpop.f32.mrb[57].mxu0  ;;  %v2005_v52 = vsub.f32 %v3149_v42, %v4498_v5 }
 0x48d   : > { %v2003_v31 = vsub.f32 %v1948_v14, %v4499_v7  ;;  %v3150_v63 = vpop.f32.mrb[58].mxu0 }
 0x48e   : > { %v2006_v9 = vsub.f32 %v3150_v63, %v4500_v28  ;;  %v2190_v32 = vpack.c.bf16 %v3150_v63, %v3149_v42  ;;  %2110 = vadd.xlane.f32.xlu0 %v2109_v0  ;;  %v1951_v40 = vpop.f32.mrb[59].mxu0  ;;  %v2037_v6 = vmul.f32 %v2005_v52, %v2005_v52 }
 0x48f   : > { %v2035_v26 = vmul.f32 %v2003_v31, %v2003_v31  ;;  %v2004_v47 = vsub.f32 %v1951_v40, %v4501_v61  ;;  %v2189_v13 = vpack.c.bf16 %v1951_v40, %v1948_v14 }
 0x490   : > { %2113 = vadd.xlane.f32.xlu1 %v2112_v30  ;;  %v2038_v45 = vmul.f32 %v2006_v9, %v2006_v9  ;;  %v2121_v54 = vsel %vm687_vm2, %v2037_v6, 0.0 }
 0x491   : > { %v2036_v4 = vmul.f32 %v2004_v47, %v2004_v47  ;;  %3183 = vmatprep.mubr.msk.bf16.mxu1 %vm687_vm2, %v2189_v13  ;;  %v2115_v36 = vsel %vm687_vm2, %v2035_v26, 0.0 }
 0x492   : > { %2116 = vadd.xlane.f32.xlu0 %v2115_v36  ;;  %3184 = vmatmul.mubr.msk.bf16.gmra.mrb[56].mxu1 %vm687_vm2, %v2190_v32  ;;  %v2124_v1 = vsel %vm687_vm2, %v2038_v45, 0.0 }
 0x493   : > { %v3153_v38 = vpop.f32.mrb[60].mxu0  ;;  %v2118_v58 = vsel %vm687_vm2, %v2036_v4, 0.0 }
 0x494   : > { %2119 = vadd.xlane.f32.xlu1 %v2118_v58  ;;  %v1964_v22 = vpop.f32.mrb[61].mxu0  ;;  %v2009_v43 = vsub.f32 %v3153_v38, %v4502_v50 }
 0x495   : > { %v2007_v57 = vsub.f32 %v1964_v22, %v4503_v19  ;;  %v3154_v51 = vpop.f32.mrb[62].mxu0 }
 0x496   : > { %v2192_v62 = vpack.c.bf16 %v3154_v51, %v3153_v38  ;;  %2122 = vadd.xlane.f32.xlu0 %v2121_v54  ;;  %v1967_v33 = vpop.f32.mrb[63].mxu0  ;;  %v2010_v24 = vsub.f32 %v3154_v51, %v4504_v2  ;;  %v2041_v10 = vmul.f32 %v2009_v43, %v2009_v43 }
 0x497   : > { %v2039_v35 = vmul.f32 %v2007_v57, %v2007_v57  ;;  %v2008_v20 = vsub.f32 %v1967_v33, %v4505_v41  ;;  %v2191_v60 = vpack.c.bf16 %v1967_v33, %v1964_v22 }
 0x498   : > { %2125 = vadd.xlane.f32.xlu1 %v2124_v1  ;;  %v2042_v44 = vmul.f32 %v2010_v24, %v2010_v24  ;;  %v2133_v53 = vsel %vm687_vm2, %v2041_v10, 0.0 }
 0x499   : > { %v2040_v11 = vmul.f32 %v2008_v20, %v2008_v20  ;;  %3187 = vmatprep.mubr.msk.bf16.mxu1 %vm687_vm2, %v2191_v60  ;;  %v2127_v34 = vsel %vm687_vm2, %v2039_v35, 0.0 }
 0x49a   : > { %2128 = vadd.xlane.f32.xlu0 %v2127_v34  ;;  %3188 = vmatmul.mubr.msk.bf16.gmra.mrb[60].mxu1 %vm687_vm2, %v2192_v62  ;;  %v2136_v23 = vsel %vm687_vm2, %v2042_v44, 0.0 }
 0x49b   : > { %v2130_v55 = vsel %vm687_vm2, %v2040_v11, 0.0 }
 0x49c   : > { %2131 = vadd.xlane.f32.xlu1 %v2130_v55 }
 0x49e   : > { %2134 = vadd.xlane.f32.xlu0 %v2133_v53 }
 0x4a0   : > { %2137 = vadd.xlane.f32.xlu1 %v2136_v23 }
 0x4ef   : > { %v2045_v29 = vpop.xlane.xlu0 %2044 }
 0x4f1   : > { %v2048_v18 = vpop.xlane.xlu1 %2047 }
 0x4f2   : > { %v2139_v17 = vadd.f32 %v2048_v18, %v2045_v29 }
 0x4f3   : > { %v2051_v25 = vpop.xlane.xlu0 %2050 }
 0x4f4   : > { %v2140_v56 = vadd.f32 %v2139_v17, %v2051_v25  ;;  %v4304_v25 = vld [vmem:[%s4373_s6] ss:$0 sm:$0xff] }
 0x4f5   : > { %v2054_v59 = vpop.xlane.xlu1 %2053 }
 0x4f6   : > { %v2141_v8 = vadd.f32 %v2140_v56, %v2054_v59 }
 0x4f7   : > { %v2057_v15 = vpop.xlane.xlu0 %2056 }
 0x4f8   : > { %v2142_v27 = vadd.f32 %v2141_v8, %v2057_v15 }
 0x4f9   : > { %v2060_v16 = vpop.xlane.xlu1 %2059 }
 0x4fa   : > { %v2143_v3 = vadd.f32 %v2142_v27, %v2060_v16 }
 0x4fb   : > { %v2063_v49 = vpop.xlane.xlu0 %2062 }
 0x4fc   : > { %v2144_v21 = vadd.f32 %v2143_v3, %v2063_v49 }
 0x4fd   : > { %v2066_v12 = vpop.xlane.xlu1 %2065 }
 0x4fe   : > { %v2145_v48 = vadd.f32 %v2144_v21, %v2066_v12 }
 0x4ff   : > { %v2069_v46 = vpop.xlane.xlu0 %2068 }
 0x500   : > { %v2146_v37 = vadd.f32 %v2145_v48, %v2069_v46 }
 0x501   : > { %v2072_v42 = vpop.xlane.xlu1 %2071 }
 0x502   : > { %v2147_v39 = vadd.f32 %v2146_v37, %v2072_v42 }
 0x503   : > { %v2075_v14 = vpop.xlane.xlu0 %2074 }
 0x504   : > { %v2148_v5 = vadd.f32 %v2147_v39, %v2075_v14 }
 0x505   : > { %v2078_v52 = vpop.xlane.xlu1 %2077 }
 0x506   : > { %v2149_v7 = vadd.f32 %v2148_v5, %v2078_v52 }
 0x507   : > { %v2081_v31 = vpop.xlane.xlu0 %2080 }
 0x508   : > { %v2150_v63 = vadd.f32 %v2149_v7, %v2081_v31 }
 0x509   : > { %v2084_v0 = vpop.xlane.xlu1 %2083 }
 0x50a   : > { %v2151_v28 = vadd.f32 %v2150_v63, %v2084_v0 }
 0x50b   : > { %v2087_v9 = vpop.xlane.xlu0 %2086 }
 0x50c   : > { %v2152_v32 = vadd.f32 %v2151_v28, %v2087_v9 }
 0x50d   : > { %v2090_v40 = vpop.xlane.xlu1 %2089 }
 0x50e   : > { %v2153_v26 = vadd.f32 %v2152_v32, %v2090_v40 }
 0x50f   : > { %v2093_v61 = vpop.xlane.xlu0 %2092 }
 0x510   : > { %v2154_v47 = vadd.f32 %v2153_v26, %v2093_v61 }
 0x511   : > { %v2096_v13 = vpop.xlane.xlu1 %2095 }
 0x512   : > { %v2155_v30 = vadd.f32 %v2154_v47, %v2096_v13 }
 0x513   : > { %v2099_v6 = vpop.xlane.xlu0 %2098 }
 0x514   : > { %v2156_v4 = vadd.f32 %v2155_v30, %v2099_v6 }
 0x515   : > { %v2102_v36 = vpop.xlane.xlu1 %2101 }
 0x516   : > { %v2157_v45 = vadd.f32 %v2156_v4, %v2102_v36 }
 0x517   : > { %v2105_v38 = vpop.xlane.xlu0 %2104 }
 0x518   : > { %v2158_v58 = vadd.f32 %v2157_v45, %v2105_v38 }
 0x519   : > { %v2108_v22 = vpop.xlane.xlu1 %2107 }
 0x51a   : > { %v2159_v50 = vadd.f32 %v2158_v58, %v2108_v22 }
 0x51b   : > { %v2111_v43 = vpop.xlane.xlu0 %2110 }
 0x51c   : > { %v2160_v19 = vadd.f32 %v2159_v50, %v2111_v43 }
 0x51d   : > { %v2114_v57 = vpop.xlane.xlu1 %2113 }
 0x51e   : > { %v2161_v51 = vadd.f32 %v2160_v19, %v2114_v57 }
 0x51f   : > { %v2117_v54 = vpop.xlane.xlu0 %2116 }
 0x520   : > { %v2162_v62 = vadd.f32 %v2161_v51, %v2117_v54 }
 0x521   : > { %v2120_v33 = vpop.xlane.xlu1 %2119 }
 0x522   : > { %v2163_v1 = vadd.f32 %v2162_v62, %v2120_v33 }
 0x523   : > { %v2123_v35 = vpop.xlane.xlu0 %2122 }
 0x524   : > { %v2164_v2 = vadd.f32 %v2163_v1, %v2123_v35 }
 0x525   : > { %v2126_v24 = vpop.xlane.xlu1 %2125 }
 0x526   : > { %v2165_v41 = vadd.f32 %v2164_v2, %v2126_v24 }
 0x527   : > { %v2129_v20 = vpop.xlane.xlu0 %2128 }
 0x528   : > { %v2166_v60 = vadd.f32 %v2165_v41, %v2129_v20 }
 0x529   : > { %v2132_v10 = vpop.xlane.xlu1 %2131 }
 0x52a   : > { %v2167_v11 = vadd.f32 %v2166_v60, %v2132_v10 }
 0x52b   : > { %v2135_v34 = vpop.xlane.xlu0 %2134 }
 0x52c   : > { %v2168_v44 = vadd.f32 %v2167_v11, %v2135_v34 }
 0x52d   : > { %v2138_v55 = vpop.xlane.xlu1 %2137 }
 0x52e   : > { %v2169_v53 = vadd.f32 %v2168_v44, %v2138_v55 }
 0x530   : > { %v2170_v23 = vrot.slane %v2169_v53, 4 }
 0x532   : > { %v2171_v29 = vadd.f32 %v2170_v23, %v2169_v53 }
 0x534   : > { %v2172_v18 = vrot.slane %v2171_v29, 2 }
 0x535   : > { %v3161_v17 = vpop.f32.mrb[32].mxu1 }
 0x536   : > { %v2173_v56 = vadd.f32 %v2172_v18, %v2171_v29  ;;  %v2298_v59 = vpop.f32.mrb[33].mxu1  ;;  %v2307_v27 = vadd.f32 %v3161_v17, %v4304_v25 }
 0x537   : > { %v3162_v8 = vpop.f32.mrb[34].mxu1  ;;  %v2299_v49 = vadd.f32 %v4304_v25, %v2298_v59 }
 0x538   : > { %v2174_v15 = vrot.slane %v2173_v56, 1  ;;  %v2310_v16 = vadd.f32 %v3162_v8, %v4304_v25  ;;  %v2301_v3 = vpop.f32.mrb[35].mxu1 }
 0x539   : > { %v2302_v21 = vadd.f32 %v4304_v25, %v2301_v3 }
 0x53a   : > { %v2175_v12 = vadd.f32 %v2174_v15, %v2173_v56  ;;  %v2891_v48 = vpack.c.bf16 %v2310_v16, %v2307_v27 }
 0x53b   : > { %v2886_v46 = vpack.c.bf16 %v2302_v21, %v2299_v49 }
 0x53c   : > { %2176 = vst [vmem:[%s319_s13] sm:$0xff] %v2175_v12  ;;  %2963 = vst [vmem:[%s4317_s28 + $0x8] sm:$0xff] %v2891_v48  }
 0x53d   : > { %2887 = vst [vmem:[%s4317_s28] sm:$0xff] %v2886_v46   ;;  %v3165_v37 = vpop.f32.mrb[36].mxu1 }
 0x53e   : > { %v2314_v42 = vpop.f32.mrb[37].mxu1  ;;  %v2323_v14 = vadd.f32 %v3165_v37, %v4304_v25 }
 0x53f   : > { %v3166_v39 = vpop.f32.mrb[38].mxu1  ;;  %v2315_v7 = vadd.f32 %v4304_v25, %v2314_v42 }
 0x540   : > { %v2326_v5 = vadd.f32 %v3166_v39, %v4304_v25  ;;  %v2317_v52 = vpop.f32.mrb[39].mxu1 }
 0x541   : > { %v2318_v31 = vadd.f32 %v4304_v25, %v2317_v52 }
 0x542   : > { %v2901_v63 = vpack.c.bf16 %v2326_v5, %v2323_v14 }
 0x543   : > { %v2896_v0 = vpack.c.bf16 %v2318_v31, %v2315_v7 }
 0x544   : > { %2965 = vst [vmem:[%s4317_s28 + $0x18] sm:$0xff] %v2901_v63  }
 0x545   : > { %2964 = vst [vmem:[%s4317_s28 + $0x10] sm:$0xff] %v2896_v0   ;;  %v3169_v28 = vpop.f32.mrb[40].mxu1 }
 0x546   : > { %v2330_v9 = vpop.f32.mrb[41].mxu1  ;;  %v2339_v40 = vadd.f32 %v3169_v28, %v4304_v25 }
 0x547   : > { %v3170_v32 = vpop.f32.mrb[42].mxu1  ;;  %v2331_v47 = vadd.f32 %v4304_v25, %v2330_v9 }
 0x548   : > { %v2342_v26 = vadd.f32 %v3170_v32, %v4304_v25  ;;  %v2333_v61 = vpop.f32.mrb[43].mxu1 }
 0x549   : > { %v2334_v13 = vadd.f32 %v4304_v25, %v2333_v61 }
 0x54a   : > { %v2911_v30 = vpack.c.bf16 %v2342_v26, %v2339_v40 }
 0x54b   : > { %v2906_v6 = vpack.c.bf16 %v2334_v13, %v2331_v47 }
 0x54c   : > { %2967 = vst [vmem:[%s4317_s28 + $0x28] sm:$0xff] %v2911_v30  }
 0x54d   : > { %2966 = vst [vmem:[%s4317_s28 + $0x20] sm:$0xff] %v2906_v6   ;;  %v3173_v4 = vpop.f32.mrb[44].mxu1 }
 0x54e   : > { %v2346_v36 = vpop.f32.mrb[45].mxu1  ;;  %v2355_v38 = vadd.f32 %v3173_v4, %v4304_v25 }
 0x54f   : > { %v3174_v45 = vpop.f32.mrb[46].mxu1  ;;  %v2347_v50 = vadd.f32 %v4304_v25, %v2346_v36 }
 0x550   : > { %v2358_v58 = vadd.f32 %v3174_v45, %v4304_v25  ;;  %v2349_v22 = vpop.f32.mrb[47].mxu1 }
 0x551   : > { %v2350_v43 = vadd.f32 %v4304_v25, %v2349_v22 }
 0x552   : > { %v2921_v19 = vpack.c.bf16 %v2358_v58, %v2355_v38 }
 0x553   : > { %v2916_v57 = vpack.c.bf16 %v2350_v43, %v2347_v50 }
 0x554   : > { %2969 = vst [vmem:[%s4317_s28 + $0x38] sm:$0xff] %v2921_v19  }
 0x555   : > { %2968 = vst [vmem:[%s4317_s28 + $0x30] sm:$0xff] %v2916_v57   ;;  %v3177_v51 = vpop.f32.mrb[48].mxu1 }
 0x556   : > { %v2362_v54 = vpop.f32.mrb[49].mxu1  ;;  %v2371_v33 = vadd.f32 %v3177_v51, %v4304_v25 }
 0x557   : > { %v3178_v62 = vpop.f32.mrb[50].mxu1  ;;  %v2363_v2 = vadd.f32 %v4304_v25, %v2362_v54 }
 0x558   : > { %v2374_v1 = vadd.f32 %v3178_v62, %v4304_v25  ;;  %v2365_v35 = vpop.f32.mrb[51].mxu1 }
 0x559   : > { %v2366_v24 = vadd.f32 %v4304_v25, %v2365_v35 }
 0x55a   : > { %v2931_v41 = vpack.c.bf16 %v2374_v1, %v2371_v33 }
 0x55b   : > { %v2926_v20 = vpack.c.bf16 %v2366_v24, %v2363_v2 }
 0x55c   : > { %2971 = vst [vmem:[%s4317_s28 + $0x48] sm:$0xff] %v2931_v41  }
 0x55d   : > { %2970 = vst [vmem:[%s4317_s28 + $0x40] sm:$0xff] %v2926_v20   ;;  %v3181_v60 = vpop.f32.mrb[52].mxu1 }
 0x55e   : > { %v2378_v10 = vpop.f32.mrb[53].mxu1  ;;  %v2387_v34 = vadd.f32 %v3181_v60, %v4304_v25 }
 0x55f   : > { %v3182_v11 = vpop.f32.mrb[54].mxu1  ;;  %v2379_v53 = vadd.f32 %v4304_v25, %v2378_v10 }
 0x560   : > { %v2390_v44 = vadd.f32 %v3182_v11, %v4304_v25  ;;  %v2381_v55 = vpop.f32.mrb[55].mxu1 }
 0x561   : > { %v2382_v23 = vadd.f32 %v4304_v25, %v2381_v55 }
 0x562   : > { %v2941_v29 = vpack.c.bf16 %v2390_v44, %v2387_v34 }
 0x563   : > { %v2936_v18 = vpack.c.bf16 %v2382_v23, %v2379_v53 }
 0x564   : > { %2973 = vst [vmem:[%s4317_s28 + $0x58] sm:$0xff] %v2941_v29  }
 0x565   : > { %2972 = vst [vmem:[%s4317_s28 + $0x50] sm:$0xff] %v2936_v18   ;;  %v3185_v17 = vpop.f32.mrb[56].mxu1 }
 0x566   : > { %v2394_v56 = vpop.f32.mrb[57].mxu1  ;;  %v2403_v8 = vadd.f32 %v3185_v17, %v4304_v25 }
 0x567   : > { %v3186_v59 = vpop.f32.mrb[58].mxu1  ;;  %v2395_v16 = vadd.f32 %v4304_v25, %v2394_v56 }
 0x568   : > { %v2406_v15 = vadd.f32 %v3186_v59, %v4304_v25  ;;  %v2397_v27 = vpop.f32.mrb[59].mxu1 }
 0x569   : > { %v2398_v3 = vadd.f32 %v4304_v25, %v2397_v27 }
 0x56a   : > { %v2951_v49 = vpack.c.bf16 %v2406_v15, %v2403_v8 }
 0x56b   : > { %v2946_v21 = vpack.c.bf16 %v2398_v3, %v2395_v16 }
 0x56c   : > { %2975 = vst [vmem:[%s4317_s28 + $0x68] sm:$0xff] %v2951_v49  }
 0x56d   : > { %2974 = vst [vmem:[%s4317_s28 + $0x60] sm:$0xff] %v2946_v21   ;;  %v3189_v12 = vpop.f32.mrb[60].mxu1 }
 0x56e   : > { %v2410_v48 = vpop.f32.mrb[61].mxu1  ;;  %v2419_v37 = vadd.f32 %v3189_v12, %v4304_v25 }
 0x56f   : > { %v3190_v46 = vpop.f32.mrb[62].mxu1  ;;  %v2411_v14 = vadd.f32 %v4304_v25, %v2410_v48 }
 0x570   : > { %v2422_v42 = vadd.f32 %v3190_v46, %v4304_v25  ;;  %v2413_v39 = vpop.f32.mrb[63].mxu1 }
 0x571   : > { %v2414_v5 = vadd.f32 %v4304_v25, %v2413_v39 }
 0x572   : > { %v2961_v52 = vpack.c.bf16 %v2422_v42, %v2419_v37 }
 0x573   : > { %v2956_v7 = vpack.c.bf16 %v2414_v5, %v2411_v14 }
 0x574   : > { %2977 = vst [vmem:[%s4317_s28 + $0x78] sm:$0xff] %v2961_v52  }
 0x575   : > { %2976 = vst [vmem:[%s4317_s28 + $0x70] sm:$0xff] %v2956_v7  }
 0x576 PF: > { %s19_s27 = sadd.s32 1, %s3227_s27  }
 0x577   : > { %p16_p5 = scmp.ge.s32.totalorder %s19_s27, 4  }
 0x579   :  { %18 = sbr.rel (!%p16_p5) target bundleno = 1 (0x1), region = 90 }

</bundles_post_ra>
